<compile_context>
chip_gen: v6e
topology: v6e:2x2x1
jax: 0.10.0
libtpu: 0.0.40
codegen_flags: <defaults>
</compile_context>

<pallas_src>
import functools

import jax
import jax.numpy as jnp
from jax import lax
from jax.experimental import pallas as pl
from jax.experimental.pallas import tpu as pltpu


# --------------------------------------------------------------------------
# Shared helper: transposed bilinear scatter weights (align_corners=True,
# padding_mode='zeros').  Works both inside the Pallas kernel (for phi) and in
# plain XLA at the wrapper level (for the fixed sampling grid).
#   gy, gx: (1, N) normalized coords in [-1, 1]; gy indexes H, gx indexes W
#   returns S with S[p, n] = bilinear weight of flat pixel p for sample n, (HW, N)
# --------------------------------------------------------------------------
def _bilinear_weights_T(gy, gx, H, W):
    N = gy.shape[-1]
    HW = H * W
    iy = (gy + 1.0) * (0.5 * (H - 1))
    ix = (gx + 1.0) * (0.5 * (W - 1))
    iy0 = jnp.floor(iy)
    ix0 = jnp.floor(ix)
    fy = iy - iy0
    fx = ix - ix0
    p = lax.broadcasted_iota(jnp.int32, (HW, N), 0)          # pixel index, sublane axis
    S = jnp.zeros((HW, N), jnp.float32)
    for dy in (0, 1):
        for dx in (0, 1):
            cy = iy0 + dy
            cx = ix0 + dx
            wy = fy if dy == 1 else 1.0 - fy
            wx = fx if dx == 1 else 1.0 - fx
            valid = (cy >= 0) & (cy <= H - 1) & (cx >= 0) & (cx <= W - 1)
            flat = (jnp.clip(cy, 0, H - 1) * W + jnp.clip(cx, 0, W - 1)).astype(jnp.int32)
            w = jnp.where(valid, wy * wx, 0.0)                # zeros padding outside
            S = S + jnp.where(p == flat, w, 0.0)
    return S


# --------------------------------------------------------------------------
# Fused kernel: phi MLP  ->  bilinear sample of I1 at phi and I2 at x  ->  SSE
# One grid step per batch item; all intermediates stay in VMEM/vregs.
# --------------------------------------------------------------------------
def _fused_sim_kernel(xT_ref, lat_ref, w1xT_ref, w1lT_ref, b1_ref,
                      w2T_ref, b2_ref, wfT_ref, bf_ref,
                      i1_ref, i2_ref, st_ref, out_ref, *, H, W):
    xT = xT_ref[...]                                                   # (2, N)

    # Latent contribution to the first pre-activation: a single (H1, 1) column.
    lat_row = lat_ref[0]                                               # (1, L)
    lat_col = jnp.sum(w1lT_ref[...] * lat_row, axis=1, keepdims=True)  # (H1, 1)

    # phi MLP, fully transposed so every activation is lane-dense (lane dim = N).
    h = jnp.dot(w1xT_ref[...], xT, preferred_element_type=jnp.float32)          # (H1, N)
    h = jnp.maximum(h + lat_col + b1_ref[...], 0.0)
    h = jnp.dot(w2T_ref[...], h, preferred_element_type=jnp.float32)            # (H2, N)
    h = jnp.maximum(h + b2_ref[...], 0.0)
    dispT = jnp.dot(wfT_ref[...], h, preferred_element_type=jnp.float32) + bf_ref[...]  # (2, N)
    phiT = dispT + xT              # phi = self.phi(x, latent)['model_out'] + x  (2, N)

    # Warped branch: build S_w^T for phi and consume it immediately (only one
    # dense scatter matrix is ever live in the kernel).
    S_w = _bilinear_weights_T(phiT[0:1, :], phiT[1:2, :], H, W)        # (HW, N)
    i1 = i1_ref[0]                                                     # (C, HW)
    i2 = i2_ref[0]
    warped = jnp.dot(i1, S_w, preferred_element_type=jnp.float32)      # (C, N) lane-dense
    # Target branch: weights precomputed in the wrapper (fixed sampling grid).
    target = jnp.dot(i2, st_ref[...], preferred_element_type=jnp.float32)  # (C, N)

    d = warped - target
    sse = jnp.sum(d * d)
    # Per-item SSE broadcast across the 128-lane output block; the wrapper reads
    # lane 0 only (do NOT sum the whole block).
    out_ref[0] = jnp.zeros((1, 128), jnp.float32) + sse


def fused_sim_sse(xT, lat3, w1xT, w1lT, b1c, w2T, b2c, wfT, bfc,
                  I1f, I2f, S_tT, H, W):
    B = lat3.shape[0]
    L = lat3.shape[2]
    C, HW = I1f.shape[1], I1f.shape[2]
    N = xT.shape[1]
    H1 = w1xT.shape[0]
    H2 = w2T.shape[0]
    kern = functools.partial(_fused_sim_kernel, H=H, W=W)
    return pl.pallas_call(
        kern,
        out_shape=jax.ShapeDtypeStruct((B, 1, 128), jnp.float32),
        grid_spec=pltpu.PrefetchScalarGridSpec(
            num_scalar_prefetch=0,
            grid=(B,),
            in_specs=[
                pl.BlockSpec((2, N), lambda b: (0, 0)),          # x^T (shared)
                pl.BlockSpec((1, 1, L), lambda b: (b, 0, 0)),    # latent code (per item)
                pl.BlockSpec((H1, 2), lambda b: (0, 0)),         # W1 coord part, transposed
                pl.BlockSpec((H1, L), lambda b: (0, 0)),         # W1 latent part, transposed
                pl.BlockSpec((H1, 1), lambda b: (0, 0)),         # b1 column
                pl.BlockSpec((H2, H1), lambda b: (0, 0)),        # W2^T
                pl.BlockSpec((H2, 1), lambda b: (0, 0)),         # b2 column
                pl.BlockSpec((2, H2), lambda b: (0, 0)),         # Wf^T
                pl.BlockSpec((2, 1), lambda b: (0, 0)),          # bf column
                pl.BlockSpec((1, C, HW), lambda b: (b, 0, 0)),   # I1 (C, HW) per item
                pl.BlockSpec((1, C, HW), lambda b: (b, 0, 0)),   # I2 (C, HW) per item
                pl.BlockSpec((HW, N), lambda b: (0, 0)),         # target scatter S_t^T
            ],
            out_specs=pl.BlockSpec((1, 1, 128), lambda b: (b, 0, 0)),
        ),
        compiler_params=pltpu.CompilerParams(dimension_semantics=("parallel",)),
    )(xT, lat3, w1xT, w1lT, b1c, w2T, b2c, wfT, bfc, I1f, I2f, S_tT)


# --------------------------------------------------------------------------
# Forward pass glue (mirrors OptBasedRegistrationMLPBase.forward)
# --------------------------------------------------------------------------
def forward(I1, I2, idx, latent_table, params, lamb, prior_lamb, n_samples=128):
    B, C, H, W = I1.shape
    w1, b1, w2, b2, wf, bf = params                    # w1: (2+L, H1), wf: (H2, 2)
    L = latent_table.shape[1]
    N = n_samples

    # sim_sampler: deterministic uniform grid of N = 16 * (N//16) points in [-1,1]^2
    ys = jnp.linspace(-1.0, 1.0, 16)
    xs = jnp.linspace(-1.0, 1.0, N // 16)
    yy, xx = jnp.meshgrid(ys, xs, indexing="ij")
    x_coords = jnp.stack([yy.reshape(-1), xx.reshape(-1)], axis=-1).astype(jnp.float32)
    xT = x_coords.T                                    # (2, N): row 0 -> H axis, row 1 -> W

    # Split + transpose phi weights (lane-dense in-kernel layout, no concat of xin).
    w1xT = w1[:2, :].T                                 # (H1, 2)
    w1lT = w1[2:, :].T                                 # (H1, L)
    b1c = b1.reshape(-1, 1)                            # (H1, 1)
    w2T = w2.T                                         # (H2, H1)
    b2c = b2.reshape(-1, 1)                            # (H2, 1)
    wfT = wf.T                                         # (2, H2)
    bfc = bf.reshape(-1, 1)                            # (2, 1)

    # latent_code(x): per-item latent (broadcast happens inside the kernel)
    lat = latent_table[idx]                            # (B, L)
    lat3 = lat[:, None, :]                             # (B, 1, L)

    # NCHW -> (B, C, H*W)  (pure reshape; flat index = y*W + x)
    I1f = I1.reshape(B, C, H * W)
    I2f = I2.reshape(B, C, H * W)

    # Target-branch bilinear weights: the sampling grid is a fixed constant, so this
    # (HW, N) matrix is computed once outside the kernel and shared across the batch.
    S_tT = _bilinear_weights_T(xT[0:1, :], xT[1:2, :], H, W)

    sse = fused_sim_sse(xT, lat3, w1xT, w1lT, b1c, w2T, b2c, wfT, bfc,
                        I1f, I2f, S_tT, H, W)          # (B, 1, 128), SSE in every lane
    total_sse = jnp.sum(sse[:, 0, 0])
    # torch grid_sample output is (B, C, 1, N) -> MSE mean over B*C*1*N elements
    sim_loss = total_sse / (B * C * N)

    reg_loss = jnp.zeros((1, 1), jnp.float32)          # self.reg(latent_code)
    prior_loss = jnp.mean(lat * lat)                   # latent_codes.reg(idx)

    loss = sim_loss + lamb * reg_loss + prior_loss * prior_lamb   # (1, 1) via broadcast
    return loss, {"sim_loss": sim_loss, "reg_loss": reg_loss}


# --------------------------------------------------------------------------
# Main
# --------------------------------------------------------------------------
if __name__ == "__main__":
    key = jax.random.PRNGKey(0)
    k = jax.random.split(key, 5)

    B, C, Himg, Wimg = 2, 1, 16, 16
    N = 128
    L = 32
    H1 = H2 = 64
    lamb = 0.1
    prior_lamb = 0.01
    num_codes = 10

    I1 = jax.random.normal(k[0], (B, C, Himg, Wimg), jnp.float32)
    I2 = jax.random.normal(k[1], (B, C, Himg, Wimg), jnp.float32)
    idx = jnp.array([0, 3], dtype=jnp.int32)

    latent_table = 0.01 * jax.random.normal(k[2], (num_codes, L), jnp.float32)
    w1 = jax.random.normal(k[3], (2 + L, H1), jnp.float32) / jnp.sqrt(2.0 + L)
    b1 = jnp.zeros((1, H1), jnp.float32)
    w2 = jax.random.normal(k[4], (H1, H2), jnp.float32) / jnp.sqrt(float(H1))
    b2 = jnp.zeros((1, H2), jnp.float32)
    wf = jnp.zeros((H2, 2), jnp.float32)    # torch.nn.init.zeros_(final_layer.weight)
    bf = jnp.zeros((1, 2), jnp.float32)     # torch.nn.init.zeros_(final_layer.bias)

    loss, aux = forward(I1, I2, idx, latent_table, (w1, b1, w2, b2, wf, bf),
                        lamb, prior_lamb, n_samples=N)
    loss = jax.block_until_ready(loss)
    jax.block_until_ready(aux["sim_loss"])
    jax.block_until_ready(aux["reg_loss"])
    print("KERNEL_OK")
</pallas_src>

<mosaic_0001>
module attributes {stable_mosaic.version = 11 : i64} {
  func.func @_fused_sim_kernel(%arg0: i32, %arg1: memref<2x128xf32, #tpu.memory_space<vmem>>, %arg2: memref<1x1x32xf32, #tpu.memory_space<vmem>>, %arg3: memref<64x2xf32, #tpu.memory_space<vmem>>, %arg4: memref<64x32xf32, #tpu.memory_space<vmem>>, %arg5: memref<64x1xf32, #tpu.memory_space<vmem>>, %arg6: memref<64x64xf32, #tpu.memory_space<vmem>>, %arg7: memref<64x1xf32, #tpu.memory_space<vmem>>, %arg8: memref<2x64xf32, #tpu.memory_space<vmem>>, %arg9: memref<2x1xf32, #tpu.memory_space<vmem>>, %arg10: memref<1x1x256xf32, #tpu.memory_space<vmem>>, %arg11: memref<1x1x256xf32, #tpu.memory_space<vmem>>, %arg12: memref<256x128xf32, #tpu.memory_space<vmem>>, %arg13: memref<1x1x128xf32, #tpu.memory_space<vmem>>) attributes {dimension_semantics = [#tpu.dimension_semantics<parallel>], iteration_bounds = array<i64: 2>, scalar_prefetch = 0 : i64, scratch_operands = 0 : i64, tpu.core_type = #tpu.core_type<tc>, window_params = [{pipeline_mode = #tpu.pipeline_mode<synchronous>, transform_indices = @transform_0, window_bounds = array<i64: 2, 128>}, {transform_indices = @transform_1, window_bounds = array<i64: 1, 1, 32>}, {pipeline_mode = #tpu.pipeline_mode<synchronous>, transform_indices = @transform_2, window_bounds = array<i64: 64, 2>}, {pipeline_mode = #tpu.pipeline_mode<synchronous>, transform_indices = @transform_3, window_bounds = array<i64: 64, 32>}, {pipeline_mode = #tpu.pipeline_mode<synchronous>, transform_indices = @transform_4, window_bounds = array<i64: 64, 1>}, {pipeline_mode = #tpu.pipeline_mode<synchronous>, transform_indices = @transform_5, window_bounds = array<i64: 64, 64>}, {pipeline_mode = #tpu.pipeline_mode<synchronous>, transform_indices = @transform_6, window_bounds = array<i64: 64, 1>}, {pipeline_mode = #tpu.pipeline_mode<synchronous>, transform_indices = @transform_7, window_bounds = array<i64: 2, 64>}, {pipeline_mode = #tpu.pipeline_mode<synchronous>, transform_indices = @transform_8, window_bounds = array<i64: 2, 1>}, {transform_indices = @transform_9, window_bounds = array<i64: 1, 1, 256>}, {transform_indices = @transform_10, window_bounds = array<i64: 1, 1, 256>}, {pipeline_mode = #tpu.pipeline_mode<synchronous>, transform_indices = @transform_11, window_bounds = array<i64: 256, 128>}, {transform_indices = @transform_12, window_bounds = array<i64: 1, 1, 128>}]} {
    %c0 = arith.constant 0 : index
    %c0_0 = arith.constant 0 : index
    %0 = vector.load %arg1[%c0, %c0_0] : memref<2x128xf32, #tpu.memory_space<vmem>>, vector<2x128xf32>
    %c0_1 = arith.constant 0 : index
    %c0_2 = arith.constant 0 : index
    %c0_3 = arith.constant 0 : index
    %1 = vector.load %arg2[%c0_1, %c0_2, %c0_3] : memref<1x1x32xf32, #tpu.memory_space<vmem>>, vector<1x1x32xf32>
    %2 = vector.shape_cast %1 : vector<1x1x32xf32> to vector<1x32xf32>
    %c0_4 = arith.constant 0 : index
    %c0_5 = arith.constant 0 : index
    %3 = vector.load %arg4[%c0_4, %c0_5] : memref<64x32xf32, #tpu.memory_space<vmem>>, vector<64x32xf32>
    %4 = vector.broadcast %2 : vector<1x32xf32> to vector<64x32xf32>
    %5 = arith.mulf %3, %4 : vector<64x32xf32>
    %cst = arith.constant dense<0.000000e+00> : vector<64xf32>
    %6 = vector.multi_reduction <add>, %5, %cst [1] : vector<64x32xf32> to vector<64xf32>
    %7 = vector.shape_cast %6 : vector<64xf32> to vector<64x1xf32>
    %c0_6 = arith.constant 0 : index
    %c0_7 = arith.constant 0 : index
    %8 = vector.load %arg3[%c0_6, %c0_7] : memref<64x2xf32, #tpu.memory_space<vmem>>, vector<64x2xf32>
    %cst_8 = arith.constant dense<0.000000e+00> : vector<64x128xf32>
    %9 = tpu.matmul %8, %0, %cst_8 {dimension_numbers = #tpu.dot_dimension_numbers<[1], [0], [0], [1], [0, 0, 1, 1], [], []>} : vector<64x2xf32>, vector<2x128xf32>, vector<64x128xf32> -> vector<64x128xf32>
    %10 = vector.broadcast %7 : vector<64x1xf32> to vector<64x128xf32>
    %11 = arith.addf %9, %10 : vector<64x128xf32>
    %c0_9 = arith.constant 0 : index
    %c0_10 = arith.constant 0 : index
    %12 = vector.load %arg5[%c0_9, %c0_10] : memref<64x1xf32, #tpu.memory_space<vmem>>, vector<64x1xf32>
    %13 = vector.broadcast %12 : vector<64x1xf32> to vector<64x128xf32>
    %14 = arith.addf %11, %13 : vector<64x128xf32>
    %cst_11 = arith.constant 0.000000e+00 : f32
    %15 = vector.broadcast %cst_11 : f32 to vector<64x128xf32>
    %16 = arith.maximumf %14, %15 : vector<64x128xf32>
    %c0_12 = arith.constant 0 : index
    %c0_13 = arith.constant 0 : index
    %17 = vector.load %arg6[%c0_12, %c0_13] : memref<64x64xf32, #tpu.memory_space<vmem>>, vector<64x64xf32>
    %cst_14 = arith.constant dense<0.000000e+00> : vector<64x128xf32>
    %18 = tpu.matmul %17, %16, %cst_14 {dimension_numbers = #tpu.dot_dimension_numbers<[1], [0], [0], [1], [0, 0, 1, 1], [], []>} : vector<64x64xf32>, vector<64x128xf32>, vector<64x128xf32> -> vector<64x128xf32>
    %c0_15 = arith.constant 0 : index
    %c0_16 = arith.constant 0 : index
    %19 = vector.load %arg7[%c0_15, %c0_16] : memref<64x1xf32, #tpu.memory_space<vmem>>, vector<64x1xf32>
    %20 = vector.broadcast %19 : vector<64x1xf32> to vector<64x128xf32>
    %21 = arith.addf %18, %20 : vector<64x128xf32>
    %cst_17 = arith.constant 0.000000e+00 : f32
    %22 = vector.broadcast %cst_17 : f32 to vector<64x128xf32>
    %23 = arith.maximumf %21, %22 : vector<64x128xf32>
    %c0_18 = arith.constant 0 : index
    %c0_19 = arith.constant 0 : index
    %24 = vector.load %arg8[%c0_18, %c0_19] : memref<2x64xf32, #tpu.memory_space<vmem>>, vector<2x64xf32>
    %cst_20 = arith.constant dense<0.000000e+00> : vector<2x128xf32>
    %25 = tpu.matmul %24, %23, %cst_20 {dimension_numbers = #tpu.dot_dimension_numbers<[1], [0], [0], [1], [0, 0, 1, 1], [], []>} : vector<2x64xf32>, vector<64x128xf32>, vector<2x128xf32> -> vector<2x128xf32>
    %c0_21 = arith.constant 0 : index
    %c0_22 = arith.constant 0 : index
    %26 = vector.load %arg9[%c0_21, %c0_22] : memref<2x1xf32, #tpu.memory_space<vmem>>, vector<2x1xf32>
    %27 = vector.broadcast %26 : vector<2x1xf32> to vector<2x128xf32>
    %28 = arith.addf %25, %27 : vector<2x128xf32>
    %29 = arith.addf %28, %0 : vector<2x128xf32>
    %30 = vector.extract_strided_slice %29 {offsets = [0, 0], sizes = [1, 128], strides = [1, 1]} : vector<2x128xf32> to vector<1x128xf32>
    %31 = vector.extract_strided_slice %29 {offsets = [1, 0], sizes = [1, 128], strides = [1, 1]} : vector<2x128xf32> to vector<1x128xf32>
    %cst_23 = arith.constant 1.000000e+00 : f32
    %32 = vector.broadcast %cst_23 : f32 to vector<1x128xf32>
    %33 = arith.addf %30, %32 : vector<1x128xf32>
    %cst_24 = arith.constant 7.500000e+00 : f32
    %34 = vector.broadcast %cst_24 : f32 to vector<1x128xf32>
    %35 = arith.mulf %33, %34 : vector<1x128xf32>
    %cst_25 = arith.constant 1.000000e+00 : f32
    %36 = vector.broadcast %cst_25 : f32 to vector<1x128xf32>
    %37 = arith.addf %31, %36 : vector<1x128xf32>
    %cst_26 = arith.constant 7.500000e+00 : f32
    %38 = vector.broadcast %cst_26 : f32 to vector<1x128xf32>
    %39 = arith.mulf %37, %38 : vector<1x128xf32>
    %40 = math.floor %35 : vector<1x128xf32>
    %41 = math.floor %39 : vector<1x128xf32>
    %42 = arith.subf %35, %40 : vector<1x128xf32>
    %43 = arith.subf %39, %41 : vector<1x128xf32>
    %44 = tpu.iota {dimensions = array<i32: 0>} : vector<256x128xi32>
    %cst_27 = arith.constant 0.000000e+00 : f32
    %45 = vector.broadcast %cst_27 : f32 to vector<256x128xf32>
    %cst_28 = arith.constant 0.000000e+00 : f32
    %46 = vector.broadcast %cst_28 : f32 to vector<1x128xf32>
    %47 = arith.addf %40, %46 : vector<1x128xf32>
    %cst_29 = arith.constant 0.000000e+00 : f32
    %48 = vector.broadcast %cst_29 : f32 to vector<1x128xf32>
    %49 = arith.addf %41, %48 : vector<1x128xf32>
    %cst_30 = arith.constant 1.000000e+00 : f32
    %50 = vector.broadcast %cst_30 : f32 to vector<1x128xf32>
    %51 = arith.subf %50, %42 : vector<1x128xf32>
    %cst_31 = arith.constant 1.000000e+00 : f32
    %52 = vector.broadcast %cst_31 : f32 to vector<1x128xf32>
    %53 = arith.subf %52, %43 : vector<1x128xf32>
    %cst_32 = arith.constant 0.000000e+00 : f32
    %54 = vector.broadcast %cst_32 : f32 to vector<1x128xf32>
    %55 = arith.cmpf oge, %47, %54 : vector<1x128xf32>
    %cst_33 = arith.constant 1.500000e+01 : f32
    %56 = vector.broadcast %cst_33 : f32 to vector<1x128xf32>
    %57 = arith.cmpf ole, %47, %56 : vector<1x128xf32>
    %58 = arith.andi %55, %57 : vector<1x128xi1>
    %cst_34 = arith.constant 0.000000e+00 : f32
    %59 = vector.broadcast %cst_34 : f32 to vector<1x128xf32>
    %60 = arith.cmpf oge, %49, %59 : vector<1x128xf32>
    %61 = arith.andi %58, %60 : vector<1x128xi1>
    %cst_35 = arith.constant 1.500000e+01 : f32
    %62 = vector.broadcast %cst_35 : f32 to vector<1x128xf32>
    %63 = arith.cmpf ole, %49, %62 : vector<1x128xf32>
    %64 = arith.andi %61, %63 : vector<1x128xi1>
    %c0_i32 = arith.constant 0 : i32
    %c15_i32 = arith.constant 15 : i32
    %65 = arith.sitofp %c0_i32 : i32 to f32
    %66 = vector.broadcast %65 : f32 to vector<1x128xf32>
    %67 = arith.maximumf %66, %47 : vector<1x128xf32>
    %68 = arith.sitofp %c15_i32 : i32 to f32
    %69 = vector.broadcast %68 : f32 to vector<1x128xf32>
    %70 = arith.minimumf %69, %67 : vector<1x128xf32>
    %cst_36 = arith.constant 1.600000e+01 : f32
    %71 = vector.broadcast %cst_36 : f32 to vector<1x128xf32>
    %72 = arith.mulf %70, %71 : vector<1x128xf32>
    %c0_i32_37 = arith.constant 0 : i32
    %c15_i32_38 = arith.constant 15 : i32
    %73 = arith.sitofp %c0_i32_37 : i32 to f32
    %74 = vector.broadcast %73 : f32 to vector<1x128xf32>
    %75 = arith.maximumf %74, %49 : vector<1x128xf32>
    %76 = arith.sitofp %c15_i32_38 : i32 to f32
    %77 = vector.broadcast %76 : f32 to vector<1x128xf32>
    %78 = arith.minimumf %77, %75 : vector<1x128xf32>
    %79 = arith.addf %72, %78 : vector<1x128xf32>
    %80 = arith.fptosi %79 : vector<1x128xf32> to vector<1x128xi32>
    %81 = arith.mulf %51, %53 : vector<1x128xf32>
    %cst_39 = arith.constant 0.000000e+00 : f32
    %82 = vector.broadcast %cst_39 : f32 to vector<1x128xf32>
    %83 = arith.select %64, %81, %82 : vector<1x128xi1>, vector<1x128xf32>
    %84 = vector.broadcast %80 : vector<1x128xi32> to vector<256x128xi32>
    %85 = arith.cmpi eq, %44, %84 : vector<256x128xi32>
    %cst_40 = arith.constant 0.000000e+00 : f32
    %86 = vector.shape_cast %83 : vector<1x128xf32> to vector<1x128xf32>
    %87 = vector.broadcast %86 : vector<1x128xf32> to vector<256x128xf32>
    %88 = vector.broadcast %cst_40 : f32 to vector<256x128xf32>
    %89 = arith.select %85, %87, %88 : vector<256x128xi1>, vector<256x128xf32>
    %90 = arith.addf %45, %89 : vector<256x128xf32>
    %cst_41 = arith.constant 0.000000e+00 : f32
    %91 = vector.broadcast %cst_41 : f32 to vector<1x128xf32>
    %92 = arith.addf %40, %91 : vector<1x128xf32>
    %cst_42 = arith.constant 1.000000e+00 : f32
    %93 = vector.broadcast %cst_42 : f32 to vector<1x128xf32>
    %94 = arith.addf %41, %93 : vector<1x128xf32>
    %cst_43 = arith.constant 1.000000e+00 : f32
    %95 = vector.broadcast %cst_43 : f32 to vector<1x128xf32>
    %96 = arith.subf %95, %42 : vector<1x128xf32>
    %cst_44 = arith.constant 0.000000e+00 : f32
    %97 = vector.broadcast %cst_44 : f32 to vector<1x128xf32>
    %98 = arith.cmpf oge, %92, %97 : vector<1x128xf32>
    %cst_45 = arith.constant 1.500000e+01 : f32
    %99 = vector.broadcast %cst_45 : f32 to vector<1x128xf32>
    %100 = arith.cmpf ole, %92, %99 : vector<1x128xf32>
    %101 = arith.andi %98, %100 : vector<1x128xi1>
    %cst_46 = arith.constant 0.000000e+00 : f32
    %102 = vector.broadcast %cst_46 : f32 to vector<1x128xf32>
    %103 = arith.cmpf oge, %94, %102 : vector<1x128xf32>
    %104 = arith.andi %101, %103 : vector<1x128xi1>
    %cst_47 = arith.constant 1.500000e+01 : f32
    %105 = vector.broadcast %cst_47 : f32 to vector<1x128xf32>
    %106 = arith.cmpf ole, %94, %105 : vector<1x128xf32>
    %107 = arith.andi %104, %106 : vector<1x128xi1>
    %c0_i32_48 = arith.constant 0 : i32
    %c15_i32_49 = arith.constant 15 : i32
    %108 = arith.sitofp %c0_i32_48 : i32 to f32
    %109 = vector.broadcast %108 : f32 to vector<1x128xf32>
    %110 = arith.maximumf %109, %92 : vector<1x128xf32>
    %111 = arith.sitofp %c15_i32_49 : i32 to f32
    %112 = vector.broadcast %111 : f32 to vector<1x128xf32>
    %113 = arith.minimumf %112, %110 : vector<1x128xf32>
    %cst_50 = arith.constant 1.600000e+01 : f32
    %114 = vector.broadcast %cst_50 : f32 to vector<1x128xf32>
    %115 = arith.mulf %113, %114 : vector<1x128xf32>
    %c0_i32_51 = arith.constant 0 : i32
    %c15_i32_52 = arith.constant 15 : i32
    %116 = arith.sitofp %c0_i32_51 : i32 to f32
    %117 = vector.broadcast %116 : f32 to vector<1x128xf32>
    %118 = arith.maximumf %117, %94 : vector<1x128xf32>
    %119 = arith.sitofp %c15_i32_52 : i32 to f32
    %120 = vector.broadcast %119 : f32 to vector<1x128xf32>
    %121 = arith.minimumf %120, %118 : vector<1x128xf32>
    %122 = arith.addf %115, %121 : vector<1x128xf32>
    %123 = arith.fptosi %122 : vector<1x128xf32> to vector<1x128xi32>
    %124 = arith.mulf %96, %43 : vector<1x128xf32>
    %cst_53 = arith.constant 0.000000e+00 : f32
    %125 = vector.broadcast %cst_53 : f32 to vector<1x128xf32>
    %126 = arith.select %107, %124, %125 : vector<1x128xi1>, vector<1x128xf32>
    %127 = vector.broadcast %123 : vector<1x128xi32> to vector<256x128xi32>
    %128 = arith.cmpi eq, %44, %127 : vector<256x128xi32>
    %cst_54 = arith.constant 0.000000e+00 : f32
    %129 = vector.shape_cast %126 : vector<1x128xf32> to vector<1x128xf32>
    %130 = vector.broadcast %129 : vector<1x128xf32> to vector<256x128xf32>
    %131 = vector.broadcast %cst_54 : f32 to vector<256x128xf32>
    %132 = arith.select %128, %130, %131 : vector<256x128xi1>, vector<256x128xf32>
    %133 = arith.addf %90, %132 : vector<256x128xf32>
    %cst_55 = arith.constant 1.000000e+00 : f32
    %134 = vector.broadcast %cst_55 : f32 to vector<1x128xf32>
    %135 = arith.addf %40, %134 : vector<1x128xf32>
    %cst_56 = arith.constant 0.000000e+00 : f32
    %136 = vector.broadcast %cst_56 : f32 to vector<1x128xf32>
    %137 = arith.addf %41, %136 : vector<1x128xf32>
    %cst_57 = arith.constant 1.000000e+00 : f32
    %138 = vector.broadcast %cst_57 : f32 to vector<1x128xf32>
    %139 = arith.subf %138, %43 : vector<1x128xf32>
    %cst_58 = arith.constant 0.000000e+00 : f32
    %140 = vector.broadcast %cst_58 : f32 to vector<1x128xf32>
    %141 = arith.cmpf oge, %135, %140 : vector<1x128xf32>
    %cst_59 = arith.constant 1.500000e+01 : f32
    %142 = vector.broadcast %cst_59 : f32 to vector<1x128xf32>
    %143 = arith.cmpf ole, %135, %142 : vector<1x128xf32>
    %144 = arith.andi %141, %143 : vector<1x128xi1>
    %cst_60 = arith.constant 0.000000e+00 : f32
    %145 = vector.broadcast %cst_60 : f32 to vector<1x128xf32>
    %146 = arith.cmpf oge, %137, %145 : vector<1x128xf32>
    %147 = arith.andi %144, %146 : vector<1x128xi1>
    %cst_61 = arith.constant 1.500000e+01 : f32
    %148 = vector.broadcast %cst_61 : f32 to vector<1x128xf32>
    %149 = arith.cmpf ole, %137, %148 : vector<1x128xf32>
    %150 = arith.andi %147, %149 : vector<1x128xi1>
    %c0_i32_62 = arith.constant 0 : i32
    %c15_i32_63 = arith.constant 15 : i32
    %151 = arith.sitofp %c0_i32_62 : i32 to f32
    %152 = vector.broadcast %151 : f32 to vector<1x128xf32>
    %153 = arith.maximumf %152, %135 : vector<1x128xf32>
    %154 = arith.sitofp %c15_i32_63 : i32 to f32
    %155 = vector.broadcast %154 : f32 to vector<1x128xf32>
    %156 = arith.minimumf %155, %153 : vector<1x128xf32>
    %cst_64 = arith.constant 1.600000e+01 : f32
    %157 = vector.broadcast %cst_64 : f32 to vector<1x128xf32>
    %158 = arith.mulf %156, %157 : vector<1x128xf32>
    %c0_i32_65 = arith.constant 0 : i32
    %c15_i32_66 = arith.constant 15 : i32
    %159 = arith.sitofp %c0_i32_65 : i32 to f32
    %160 = vector.broadcast %159 : f32 to vector<1x128xf32>
    %161 = arith.maximumf %160, %137 : vector<1x128xf32>
    %162 = arith.sitofp %c15_i32_66 : i32 to f32
    %163 = vector.broadcast %162 : f32 to vector<1x128xf32>
    %164 = arith.minimumf %163, %161 : vector<1x128xf32>
    %165 = arith.addf %158, %164 : vector<1x128xf32>
    %166 = arith.fptosi %165 : vector<1x128xf32> to vector<1x128xi32>
    %167 = arith.mulf %42, %139 : vector<1x128xf32>
    %cst_67 = arith.constant 0.000000e+00 : f32
    %168 = vector.broadcast %cst_67 : f32 to vector<1x128xf32>
    %169 = arith.select %150, %167, %168 : vector<1x128xi1>, vector<1x128xf32>
    %170 = vector.broadcast %166 : vector<1x128xi32> to vector<256x128xi32>
    %171 = arith.cmpi eq, %44, %170 : vector<256x128xi32>
    %cst_68 = arith.constant 0.000000e+00 : f32
    %172 = vector.shape_cast %169 : vector<1x128xf32> to vector<1x128xf32>
    %173 = vector.broadcast %172 : vector<1x128xf32> to vector<256x128xf32>
    %174 = vector.broadcast %cst_68 : f32 to vector<256x128xf32>
    %175 = arith.select %171, %173, %174 : vector<256x128xi1>, vector<256x128xf32>
    %176 = arith.addf %133, %175 : vector<256x128xf32>
    %cst_69 = arith.constant 1.000000e+00 : f32
    %177 = vector.broadcast %cst_69 : f32 to vector<1x128xf32>
    %178 = arith.addf %40, %177 : vector<1x128xf32>
    %cst_70 = arith.constant 1.000000e+00 : f32
    %179 = vector.broadcast %cst_70 : f32 to vector<1x128xf32>
    %180 = arith.addf %41, %179 : vector<1x128xf32>
    %cst_71 = arith.constant 0.000000e+00 : f32
    %181 = vector.broadcast %cst_71 : f32 to vector<1x128xf32>
    %182 = arith.cmpf oge, %178, %181 : vector<1x128xf32>
    %cst_72 = arith.constant 1.500000e+01 : f32
    %183 = vector.broadcast %cst_72 : f32 to vector<1x128xf32>
    %184 = arith.cmpf ole, %178, %183 : vector<1x128xf32>
    %185 = arith.andi %182, %184 : vector<1x128xi1>
    %cst_73 = arith.constant 0.000000e+00 : f32
    %186 = vector.broadcast %cst_73 : f32 to vector<1x128xf32>
    %187 = arith.cmpf oge, %180, %186 : vector<1x128xf32>
    %188 = arith.andi %185, %187 : vector<1x128xi1>
    %cst_74 = arith.constant 1.500000e+01 : f32
    %189 = vector.broadcast %cst_74 : f32 to vector<1x128xf32>
    %190 = arith.cmpf ole, %180, %189 : vector<1x128xf32>
    %191 = arith.andi %188, %190 : vector<1x128xi1>
    %c0_i32_75 = arith.constant 0 : i32
    %c15_i32_76 = arith.constant 15 : i32
    %192 = arith.sitofp %c0_i32_75 : i32 to f32
    %193 = vector.broadcast %192 : f32 to vector<1x128xf32>
    %194 = arith.maximumf %193, %178 : vector<1x128xf32>
    %195 = arith.sitofp %c15_i32_76 : i32 to f32
    %196 = vector.broadcast %195 : f32 to vector<1x128xf32>
    %197 = arith.minimumf %196, %194 : vector<1x128xf32>
    %cst_77 = arith.constant 1.600000e+01 : f32
    %198 = vector.broadcast %cst_77 : f32 to vector<1x128xf32>
    %199 = arith.mulf %197, %198 : vector<1x128xf32>
    %c0_i32_78 = arith.constant 0 : i32
    %c15_i32_79 = arith.constant 15 : i32
    %200 = arith.sitofp %c0_i32_78 : i32 to f32
    %201 = vector.broadcast %200 : f32 to vector<1x128xf32>
    %202 = arith.maximumf %201, %180 : vector<1x128xf32>
    %203 = arith.sitofp %c15_i32_79 : i32 to f32
    %204 = vector.broadcast %203 : f32 to vector<1x128xf32>
    %205 = arith.minimumf %204, %202 : vector<1x128xf32>
    %206 = arith.addf %199, %205 : vector<1x128xf32>
    %207 = arith.fptosi %206 : vector<1x128xf32> to vector<1x128xi32>
    %208 = arith.mulf %42, %43 : vector<1x128xf32>
    %cst_80 = arith.constant 0.000000e+00 : f32
    %209 = vector.broadcast %cst_80 : f32 to vector<1x128xf32>
    %210 = arith.select %191, %208, %209 : vector<1x128xi1>, vector<1x128xf32>
    %211 = vector.broadcast %207 : vector<1x128xi32> to vector<256x128xi32>
    %212 = arith.cmpi eq, %44, %211 : vector<256x128xi32>
    %cst_81 = arith.constant 0.000000e+00 : f32
    %213 = vector.shape_cast %210 : vector<1x128xf32> to vector<1x128xf32>
    %214 = vector.broadcast %213 : vector<1x128xf32> to vector<256x128xf32>
    %215 = vector.broadcast %cst_81 : f32 to vector<256x128xf32>
    %216 = arith.select %212, %214, %215 : vector<256x128xi1>, vector<256x128xf32>
    %217 = arith.addf %176, %216 : vector<256x128xf32>
    %c0_82 = arith.constant 0 : index
    %c0_83 = arith.constant 0 : index
    %c0_84 = arith.constant 0 : index
    %218 = vector.load %arg10[%c0_82, %c0_83, %c0_84] : memref<1x1x256xf32, #tpu.memory_space<vmem>>, vector<1x1x256xf32>
    %219 = vector.shape_cast %218 : vector<1x1x256xf32> to vector<1x256xf32>
    %c0_85 = arith.constant 0 : index
    %c0_86 = arith.constant 0 : index
    %c0_87 = arith.constant 0 : index
    %220 = vector.load %arg11[%c0_85, %c0_86, %c0_87] : memref<1x1x256xf32, #tpu.memory_space<vmem>>, vector<1x1x256xf32>
    %221 = vector.shape_cast %220 : vector<1x1x256xf32> to vector<1x256xf32>
    %cst_88 = arith.constant dense<0.000000e+00> : vector<1x128xf32>
    %222 = tpu.matmul %219, %217, %cst_88 {dimension_numbers = #tpu.dot_dimension_numbers<[1], [0], [0], [1], [0, 0, 1, 1], [], []>} : vector<1x256xf32>, vector<256x128xf32>, vector<1x128xf32> -> vector<1x128xf32>
    %c0_89 = arith.constant 0 : index
    %c0_90 = arith.constant 0 : index
    %223 = vector.load %arg12[%c0_89, %c0_90] : memref<256x128xf32, #tpu.memory_space<vmem>>, vector<256x128xf32>
    %cst_91 = arith.constant dense<0.000000e+00> : vector<1x128xf32>
    %224 = tpu.matmul %221, %223, %cst_91 {dimension_numbers = #tpu.dot_dimension_numbers<[1], [0], [0], [1], [0, 0, 1, 1], [], []>} : vector<1x256xf32>, vector<256x128xf32>, vector<1x128xf32> -> vector<1x128xf32>
    %225 = arith.subf %222, %224 : vector<1x128xf32>
    %226 = arith.mulf %225, %225 : vector<1x128xf32>
    %227 = vector.shape_cast %226 : vector<1x128xf32> to vector<1x1x128xf32>
    %cst_92 = arith.constant dense<0.000000e+00> : vector<1xf32>
    %228 = vector.multi_reduction <add>, %227, %cst_92 [1, 2] : vector<1x1x128xf32> to vector<1xf32>
    %229 = vector.shape_cast %228 : vector<1xf32> to vector<1x1x1xf32>
    %230 = vector.extract %229[0, 0, 0] : f32 from vector<1x1x1xf32>
    %cst_93 = arith.constant 0.000000e+00 : f32
    %231 = vector.broadcast %cst_93 : f32 to vector<1x128xf32>
    %232 = vector.broadcast %230 : f32 to vector<1x128xf32>
    %233 = arith.addf %231, %232 : vector<1x128xf32>
    %c0_94 = arith.constant 0 : index
    %c0_95 = arith.constant 0 : index
    %c0_96 = arith.constant 0 : index
    %234 = vector.load %arg13[%c0_94, %c0_95, %c0_96] : memref<1x1x128xf32, #tpu.memory_space<vmem>>, vector<1x1x128xf32>
    %235 = vector.shape_cast %234 : vector<1x1x128xf32> to vector<1x128xf32>
    %236 = vector.shape_cast %233 : vector<1x128xf32> to vector<1x1x128xf32>
    tpu.vector_store %arg13[%c0_94, %c0_95, %c0_96], %236 {strides = array<i32>} : memref<1x1x128xf32, #tpu.memory_space<vmem>>, vector<1x1x128xf32>,
    return
  }
  func.func @transform_0(%arg0: i32) -> (i32, i32) {
    %c0_i32 = arith.constant 0 : i32
    %c0_i32_0 = arith.constant 0 : i32
    %c0_i32_1 = arith.constant 0 : i32
    return %c0_i32, %c0_i32_0 : i32, i32
  }
  func.func @transform_1(%arg0: i32) -> (i32, i32, i32) {
    %c0_i32 = arith.constant 0 : i32
    %c0_i32_0 = arith.constant 0 : i32
    %c0_i32_1 = arith.constant 0 : i32
    return %arg0, %c0_i32, %c0_i32_0 : i32, i32, i32
  }
  func.func @transform_2(%arg0: i32) -> (i32, i32) {
    %c0_i32 = arith.constant 0 : i32
    %c0_i32_0 = arith.constant 0 : i32
    %c0_i32_1 = arith.constant 0 : i32
    return %c0_i32, %c0_i32_0 : i32, i32
  }
  func.func @transform_3(%arg0: i32) -> (i32, i32) {
    %c0_i32 = arith.constant 0 : i32
    %c0_i32_0 = arith.constant 0 : i32
    %c0_i32_1 = arith.constant 0 : i32
    return %c0_i32, %c0_i32_0 : i32, i32
  }
  func.func @transform_4(%arg0: i32) -> (i32, i32) {
    %c0_i32 = arith.constant 0 : i32
    %c0_i32_0 = arith.constant 0 : i32
    %c0_i32_1 = arith.constant 0 : i32
    return %c0_i32, %c0_i32_0 : i32, i32
  }
  func.func @transform_5(%arg0: i32) -> (i32, i32) {
    %c0_i32 = arith.constant 0 : i32
    %c0_i32_0 = arith.constant 0 : i32
    %c0_i32_1 = arith.constant 0 : i32
    return %c0_i32, %c0_i32_0 : i32, i32
  }
  func.func @transform_6(%arg0: i32) -> (i32, i32) {
    %c0_i32 = arith.constant 0 : i32
    %c0_i32_0 = arith.constant 0 : i32
    %c0_i32_1 = arith.constant 0 : i32
    return %c0_i32, %c0_i32_0 : i32, i32
  }
  func.func @transform_7(%arg0: i32) -> (i32, i32) {
    %c0_i32 = arith.constant 0 : i32
    %c0_i32_0 = arith.constant 0 : i32
    %c0_i32_1 = arith.constant 0 : i32
    return %c0_i32, %c0_i32_0 : i32, i32
  }
  func.func @transform_8(%arg0: i32) -> (i32, i32) {
    %c0_i32 = arith.constant 0 : i32
    %c0_i32_0 = arith.constant 0 : i32
    %c0_i32_1 = arith.constant 0 : i32
    return %c0_i32, %c0_i32_0 : i32, i32
  }
  func.func @transform_9(%arg0: i32) -> (i32, i32, i32) {
    %c0_i32 = arith.constant 0 : i32
    %c0_i32_0 = arith.constant 0 : i32
    %c0_i32_1 = arith.constant 0 : i32
    return %arg0, %c0_i32, %c0_i32_0 : i32, i32, i32
  }
  func.func @transform_10(%arg0: i32) -> (i32, i32, i32) {
    %c0_i32 = arith.constant 0 : i32
    %c0_i32_0 = arith.constant 0 : i32
    %c0_i32_1 = arith.constant 0 : i32
    return %arg0, %c0_i32, %c0_i32_0 : i32, i32, i32
  }
  func.func @transform_11(%arg0: i32) -> (i32, i32) {
    %c0_i32 = arith.constant 0 : i32
    %c0_i32_0 = arith.constant 0 : i32
    %c0_i32_1 = arith.constant 0 : i32
    return %c0_i32, %c0_i32_0 : i32, i32
  }
  func.func @transform_12(%arg0: i32) -> (i32, i32, i32) {
    %c0_i32 = arith.constant 0 : i32
    %c0_i32_0 = arith.constant 0 : i32
    %c0_i32_1 = arith.constant 0 : i32
    return %arg0, %c0_i32, %c0_i32_0 : i32, i32, i32
  }
}

</mosaic_0001>

<bundles_post_ra>
// kernel: tpu_custom_call.1
= control target key start
LH: loop header
LB: loop body
LE: loop exit
PB: predicated region body
PF: predicated region fallthrough
CT: control target
= control target key end

     0   :  { %s3182_s0 = inlined_call_operand.vmem [shape: f32[2,128], index: 0, kind: input, shape index: {}]   ;;  %s3183_s1 = inlined_call_operand.vmem [shape: f32[2,1,32], index: 1, kind: input, shape index: {}]   ;;  %s3184_s2 = inlined_call_operand.vmem [shape: f32[64,2], index: 2, kind: input, shape index: {}]   ;;  %s3185_s3 = inlined_call_operand.vmem [shape: f32[64,32], index: 3, kind: input, shape index: {}]   ;;  %s3186_s4 = inlined_call_operand.vmem [shape: f32[64,1], index: 4, kind: input, shape index: {}]   ;;  %s3187_s5 = inlined_call_operand.hbm [shape: f32[64,64], index: 5, kind: input, shape index: {}]   ;;  %s3188_s6 = inlined_call_operand.vmem [shape: f32[64,1], index: 6, kind: input, shape index: {}]   ;;  %s3189_s7 = inlined_call_operand.vmem [shape: f32[2,64], index: 7, kind: input, shape index: {}]   ;;  %s3190_s8 = inlined_call_operand.vmem [shape: f32[2,1], index: 8, kind: input, shape index: {}]   ;;  %s3191_s9 = inlined_call_operand.vmem [shape: f32[2,1,256], index: 9, kind: input, shape index: {}]   ;;  %s3192_s10 = inlined_call_operand.vmem [shape: f32[2,1,256], index: 10, kind: input, shape index: {}]   ;;  %s3193_s11 = inlined_call_operand.vmem [shape: f32[256,128], index: 11, kind: input, shape index: {}]   ;;  %s3194_s12 = inlined_call_operand.hbm [shape: f32[2,1,128], index: 12, kind: output, shape index: {}]  }
   0x1   :  { %3195 = sst [smem:[#allocation8_spill]] %s3182_s0 }
   0x2   :  { %3196 = sst [smem:[#allocation9_spill]] %s3183_s1 }
   0x3   :  { %3197 = sst [smem:[#allocation10_spill]] %s3184_s2 }
   0x4   :  { %3198 = sst [smem:[#allocation11_spill]] %s3187_s5 }
   0x5   :  { %17 = vsyncpa [#allocation3], 0 }
   0x6   :  { %18 = vsyncpa [#allocation4], 0 }
   0x7   :  { %20 = vsyncpa [#allocation4 + $0x1], 0  ;;  %s2239_s21 = smov 0   ;;  %s2241_s22 = smov 0  }
   0x8   :  { %s2243_s23 = smov 0   ;;  %s2245_s24 = smov 0  }
   0x9 LB: > { %s2260_s25 = sadd.s32 4294967295, %s2165_s24   ;;  %s1813_s26 = sadd.s32 4294967294, %s2165_s24   ;;  %s2165_s24 = sphi %s2245_s24, %s3226_s24   ;;  %s2161_s23 = sphi %s2243_s23, %s3225_s23   ;;  %s2157_s22 = sphi %s2241_s22, %s3224_s22   ;;  %s2153_s21 = sphi %s2239_s21, %s3223_s21  }
   0xa   : > { %s2264_s27 = sadd.s32 1, %s2165_s24   ;;  %s300_s28 = sadd.s32 1, %s2161_s23 }
   0xb   : > { %s297_s29 = ssub.s32 %s2165_s24, %s2264_s27  ;;  %p310_p0 = scmp.ne.s32.totalorder %s2161_s23, %s2157_s22 }
   0xc   : > { %p298_p1 = scmp.eq.s32.totalorder %s297_s29, 0  ;;  %p311_p2 = scmp.eq.s32.totalorder %s2260_s25, 1 }
   0xd   : > { %p316_p3 = scmp.ne.s32.totalorder %s2157_s22, %s2153_s21  ;;  %p317_p4 = scmp.eq.s32.totalorder %s1813_s26, 1 }
   0xe   : > { %s2275_s30 = scalar_select %p298_p1, %s2161_s23, %s300_s28  }
   0xf   : > { %p2277_p5 = por %p311_p2, %p310_p0  ;;  %p2281_p6 = por %p317_p4, %p316_p3 }
  0x10   : > { %p1814_p7 = scmp.ge.s32.totalorder %s2165_s24, 1  ;;  %p324_p8 = scmp.lt.s32.totalorder %s2165_s24, 3 }
  0x11   : > { %s3200_s14 = scalar_select %p2281_p6, 1, 0 }
  0x12   : > { %p2032_p9 = scmp.eq.s32.totalorder %s2260_s25, 0  ;;  %p2288_p10 = pnand %p1814_p7, %p324_p8 }
  0x13   : > { %s2167_s16 = smov [#allocation2]  }
  0x14   : > { %s348_s17 = sshll.u32 %s2167_s16, 4  ;;  %p2024_p11 = pneg %p2288_p10  ;;  %s349_s17 = int_to_ptr.vmem [resolvable:$true] %s348_s17 }
  0x15   : > { %s2086_s18 = scalar_lea.vmem %s349_s17, 1024  ;;  %p2094_p3 = scmp.lt.s32.totalorder %s349_s17, %s349_s17 }
  0x16   : > { %p2025_p12 = pnand %p2032_p9, %p2024_p11  ;;  %p2087_p0 = scmp.ne.s32.totalorder %s349_s17, %s2086_s18 }
  0x17   : > { %p2095_p4 = scmp.lt.s32.totalorder %s2086_s18, %s2086_s18 }
  0x18   : > { %p2077_p13 = pneg %p2025_p12 }
  0x19   : > { %p2096_p6 = por %p2095_p4, %p2094_p3 }
  0x1a   : > { %p2089_p1 = pnand %p2087_p0, %p2077_p13 }
  0x1c   : > { %p2090_p2 = pneg %p2089_p1 }
  0x1e   : > { %p2097_p7 = pnand %p2096_p6, %p2090_p2 }
  0x20   : > { %2100 = shalt.err (!%p2097_p7)
}
  0x21   : > { %s2168_s19 = smov 128   ;;  %s2169_s20 = smov 8  }
  0x22   : > { %s3202_s5 = sld [smem:[#allocation11_spill]] }
  0x24   : > { %396 = sbr.rel (%p2288_p10) target bundleno = 1233 (0x4d1), region = 68 }
  0x28   : > { %2027 = dma.hbm_to_vmem [thread:$0]  (!%p2025_p12), %s3202_s5, 1024, %s349_s17, [#allocation3], %s2168_s19, %s2168_s19, %s2169_s20  }
  0x29   : > { %2144 = dma.done.wait (%p2032_p9), [#allocation3], 1024  }
  0x2a   : > { %2146 = vsyncadd (%p2032_p9), [#allocation3], 4294966272  ;;  %p443_p8 = scmp.lt.s32.totalorder %s2260_s25, 1  ;;  %v2170_v0 = vmov 0   ;;  %vm536_vm0 = vcmask 1041408   ;;  %vm511_vm1 = vcmask 15360  }
  0x2b   : > { %2073 = vset.pattern.permute.xlu1 %v2170_v0  ;;  %2074 = vset.pattern.permute.xlu0 %v2170_v0  ;;  %s3203_s1 = sld [smem:[#allocation9_spill]]  ;;  %v461_v5 = vld [vmem:[%s3185_s3 + $0x28] sm:$0xff]  ;;  %vm478_vm2 = vcmask 261120   ;;  %v463_v6 = vld [vmem:[%s3185_s3 + $0x38] sm:$0xff]  ;;  %v460_v10 = vld [vmem:[%s3185_s3 + $0x20] sm:$0xff]  ;;  %vm765_vm3 = vcmask 523264  }
  0x2c   : > { %s2307_s29 = scalar_select %p443_p8, %s2260_s25, 1  ;;  %v462_v12 = vld [vmem:[%s3185_s3 + $0x30] sm:$0xff]  ;;  %v459_v17 = vld [vmem:[%s3185_s3 + $0x18] sm:$0xff]  ;;  %v650_v31 = vld [vmem:[%s3186_s4 + $0x28] sm:$0xff]  ;;  %vm2172_vm4 = vmmov 0  }
  0x2d   : > { %s3204_s0 = sld [smem:[#allocation8_spill]]  ;;  %v458_v22 = vld [vmem:[%s3185_s3 + $0x10] sm:$0xff]  ;;  %v652_v29 = vld [vmem:[%s3186_s4 + $0x38] sm:$0xff]  ;;  %v649_v32 = vld [vmem:[%s3186_s4 + $0x20] sm:$0xff]  ;;  %s1840_s15 = sshll.u32 %s2260_s25, 4 }
  0x2e   : > { %s3205_s2 = sld [smem:[#allocation10_spill]]  ;;  %v651_v30 = vld [vmem:[%s3186_s4 + $0x30] sm:$0xff]  ;;  %v646_v34 = vld [vmem:[%s3186_s4 + $0x8] sm:$0xff]  ;;  %v645_v37 = vld [vmem:[%s3186_s4] sm:$0xff]  ;;  %s1819_s16 = sshll.u32 %s2307_s29, 1 }
  0x2f   : > { %v647_v33 = vld [vmem:[%s3186_s4 + $0x10] sm:$0xff]  ;;  %v457_v35 = vld [vmem:[%s3185_s3 + $0x8] sm:$0xff]  ;;  %v456_v38 = vld [vmem:[%s3185_s3] sm:$0xff]  ;;  %s453_s5 = scalar_lea.vmem %s3192_s10, %s1819_s16  ;;  %s449_s26 = scalar_lea.vmem %s3191_s9, %s1819_s16 }
  0x30   : > { %v724_v41 = vld [vmem:[%s3188_s6 + $0x38] sm:$0xff]  ;;  %v722_v43 = vld [vmem:[%s3188_s6 + $0x28] sm:$0xff]  ;;  %v904_v46 = vld [vmem:[%s3190_s8] sm:$0x3] }
  0x31   : > { %s445_s17 = scalar_lea.vmem %s3203_s1, %s2307_s29  ;;  %v720_v44 = vld [vmem:[%s3188_s6 + $0x18] sm:$0xff]  ;;  %v718_v45 = vld [vmem:[%s3188_s6 + $0x8] sm:$0xff]  ;;  %v723_v48 = vld [vmem:[%s3188_s6 + $0x30] sm:$0xff]  ;;  %s441_s29 = sand.u32 1, %s2157_s22  }
  0x32   : > { %v1821_v4 = vld [vmem:[%s445_s17] ss:$0 sm:$0xff]  ;;  %v648_v47 = vld [vmem:[%s3186_s4 + $0x18] sm:$0xff]  ;;  %v719_v50 = vld [vmem:[%s3188_s6 + $0x10] sm:$0xff]  ;;  %s442_s28 = scalar_lea.vmem [#allocation5], %s441_s29 }
  0x33   : > { %v2318_v1 = vld [vmem:[%s3204_s0] sm:$0x3]  ;;  %v475_v7 = vmul.f32 %v1821_v4, %v461_v5  ;;  %v477_v8 = vmul.f32 %v1821_v4, %v463_v6  ;;  %v474_v11 = vmul.f32 %v1821_v4, %v460_v10  ;;  %v476_v16 = vmul.f32 %v1821_v4, %v462_v12  ;;  %s1725_s17 = sshll.u32 %s442_s28, 4  ;;  %s1713_s0 = scalar_lea.sflag [#allocation4], %s441_s29  ;;  %s3144_s17 = int_to_ptr.vmem [resolvable:$true] %s1725_s17 }
  0x34   : > { %v503_v2 = vld [vmem:[%s3205_s2] sm:$0xff]  ;;  %v504_v3 = vld [vmem:[%s3205_s2 + $0x8] sm:$0xff]  ;;  %1947 = vmatprep.subr.msk.mxu0 %vm536_vm0, %v2318_v1  ;;  %v505_v9 = vld [vmem:[%s3205_s2 + $0x10] sm:$0xff]  ;;  %v473_v21 = vmul.f32 %v1821_v4, %v459_v17  ;;  %v472_v26 = vmul.f32 %v1821_v4, %v458_v22  ;;  %v471_v36 = vmul.f32 %v1821_v4, %v457_v35  ;;  %v470_v40 = vmul.f32 %v1821_v4, %v456_v38  ;;  %s2101_s20 = scalar_lea.vmem %s3144_s17, 16 }
  0x35   : > { %1949 = vmatprep.mubr.msk.f32.mxu0 %vm511_vm1, %v503_v2  ;;  %1948 = vmatpush3.msk.msra.mxu0 %vm536_vm0, %v2318_v1  ;;  %v494_v13 = vsel %vm478_vm2, %v475_v7, 0.0  ;;  %v500_v14 = vsel %vm478_vm2, %v477_v8, 0.0  ;;  %v506_v15 = vld [vmem:[%s3205_s2 + $0x18] sm:$0xff]  ;;  %v507_v18 = vld [vmem:[%s3205_s2 + $0x20] sm:$0xff]  ;;  %v491_v19 = vsel %vm478_vm2, %v474_v11, 0.0  ;;  %v497_v20 = vsel %vm478_vm2, %v476_v16, 0.0  ;;  %p2102_p6 = scmp.ne.s32.totalorder %s3144_s17, %s2101_s20 }
  0x36   : > { %1950 = vmatmul.mubr.msk.f32.vlgmr.msra.gmra.mxu0 %vm511_vm1, %v504_v3  ;;  %495 = vadd.xlane.f32.xlu1 %v494_v13  ;;  %v508_v23 = vld [vmem:[%s3205_s2 + $0x28] sm:$0xff]  ;;  %v509_v24 = vld [vmem:[%s3205_s2 + $0x30] sm:$0xff]  ;;  %v488_v25 = vsel %vm478_vm2, %v473_v21, 0.0  ;;  %v510_v27 = vld [vmem:[%s3205_s2 + $0x38] sm:$0xff]  ;;  %v485_v28 = vsel %vm478_vm2, %v472_v26, 0.0  ;;  %v482_v39 = vsel %vm478_vm2, %v471_v36, 0.0 }
  0x37   : > { %1952 = vmatprep.mubr.msk.f32.mxu0 %vm511_vm1, %v505_v9  ;;  %501 = vadd.xlane.f32.xlu0 %v500_v14  ;;  %v479_v42 = vsel %vm478_vm2, %v470_v40, 0.0  ;;  %v721_v49 = vld [vmem:[%s3188_s6 + $0x20] sm:$0xff]  ;;  %v711_v40 = vld [vmem:[#allocation2 + $0x10] sm:$0xff]  ;;  %p2103_p9 = pnand %p2102_p6, %p2277_p5 }
  0x38   : > { %v717_v51 = vld [vmem:[%s3188_s6] sm:$0xff] }
  0x39   : > { %v709_v52 = vld [vmem:[#allocation2] sm:$0xff]  ;;  %p2104_p10 = pneg %p2103_p9 }
  0x3a   : > { %1953 = vmatmul.mubr.msk.f32.gmra.mxu0 %vm511_vm1, %v506_v15  ;;  %492 = vadd.xlane.f32.xlu1 %v491_v19 }
  0x3b   : > { %1955 = vmatprep.mubr.msk.f32.mxu0 %vm511_vm1, %v507_v18  ;;  %498 = vadd.xlane.f32.xlu0 %v497_v20 }
  0x3c   : > { %1977 = vmatprep.mubr.msk.f32.mxu1 %vm765_vm3, %v709_v52 }
  0x3e   : > { %1956 = vmatmul.mubr.msk.f32.gmra.mxu0 %vm511_vm1, %v508_v23 }
  0x3f   : > { %1958 = vmatprep.mubr.msk.f32.mxu0 %vm511_vm1, %v509_v24  ;;  %489 = vadd.xlane.f32.xlu0 %v488_v25 }
  0x42   : > { %1959 = vmatmul.mubr.msk.f32.gmra.mxu0 %vm511_vm1, %v510_v27 }
  0x43   : > { %486 = vadd.xlane.f32.xlu0 %v485_v28 }
  0x4b   : > { %690 = vperm.xlu1 %2073, %v652_v29  }
  0x59   : > { %685 = vperm.xlu0 %2074, %v651_v30  }
  0x5d   : > { %680 = vperm.xlu0 %2074, %v650_v31  }
  0x61   : > { %675 = vperm.xlu0 %2074, %v649_v32  }
  0x65   : > { %665 = vperm.xlu0 %2074, %v647_v33  }
  0x69   : > { %660 = vperm.xlu0 %2074, %v646_v34  }
  0x6d   : > { %655 = vperm.xlu0 %2074, %v645_v37  }
  0x6f   : > { %483 = vadd.xlane.f32.xlu1 %v482_v39  ;;  %v710_v39 = vld [vmem:[#allocation2 + $0x8] sm:$0xff] }
  0x71   : > { %762 = vperm.xlu0 %2074, %v724_v41   ;;  %v712_v41 = vld [vmem:[#allocation2 + $0x18] sm:$0xff] }
  0x73   : > { %480 = vadd.xlane.f32.xlu1 %v479_v42  ;;  %v713_v42 = vld [vmem:[#allocation2 + $0x20] sm:$0xff] }
  0x75   : > { %752 = vperm.xlu0 %2074, %v722_v43   ;;  %v714_v43 = vld [vmem:[#allocation2 + $0x28] sm:$0xff] }
  0x79   : > { %742 = vperm.xlu0 %2074, %v720_v44   ;;  %v715_v44 = vld [vmem:[#allocation2 + $0x30] sm:$0xff] }
  0x7d   : > { %732 = vperm.xlu0 %2074, %v718_v45   ;;  %v716_v45 = vld [vmem:[#allocation2 + $0x38] sm:$0xff] }
  0x81   : > { %907 = vperm.xlu0 %2074, %v904_v46   ;;  %v2171_v46 = vmov 0.0  }
  0x82   : > { %1989 = vmatprep.subr.mxu0 %v2171_v46  ;;  %2005 = vmatprep.mubr.msk.f32.mxu0 %vm2172_vm4, %v2171_v46 }
  0x84   : > { %670 = vperm.xlu1 %2073, %v648_v47  }
  0x88   : > { %757 = vperm.xlu1 %2073, %v723_v48  }
  0x8c   : > { %747 = vperm.xlu1 %2073, %v721_v49  }
  0x90   : > { %737 = vperm.xlu1 %2073, %v719_v50  }
  0x94   : > { %727 = vperm.xlu1 %2073, %v717_v51  }
  0xbf   : > { %v496_v56 = vpop.xlane.xlu1 %495 }
  0xc0   : > { %v502_v53 = vpop.xlane.xlu0 %501 }
  0xc3   : > { %v493_v58 = vpop.xlane.xlu1 %492 }
  0xc4   : > { %v499_v54 = vpop.xlane.xlu0 %498 }
  0xc7   : > { %v691_v62 = vpop.permute.xlu1 %690 }
  0xc8   : > { %v490_v55 = vpop.xlane.xlu0 %489 }
  0xcc   : > { %v487_v57 = vpop.xlane.xlu0 %486 }
  0xd4   : > { %v686_v59 = vpop.permute.xlu0 %685 }
  0xd8   : > { %v681_v63 = vpop.permute.xlu0 %680 }
  0xdc   : > { %v676_v6 = vpop.permute.xlu0 %675 }
  0xe0   : > { %v666_v13 = vpop.permute.xlu0 %665 }
  0xe4   : > { %v661_v25 = vpop.permute.xlu0 %660 }
  0xe8   : > { %v656_v34 = vpop.permute.xlu0 %655 }
  0xec   : > { %v763_v49 = vpop.permute.xlu0 %762 }
  0xf6   : > { %v1951_v60 = vpop.f32.mrf.mxu0 }
  0xf8   : > { %v606_v61 = vpop.f32.mrf.mxu0  ;;  %v484_v4 = vpop.xlane.xlu1 %483 }
  0xf9   : > { %v612_v26 = vadd.f32 %v1951_v60, %v484_v4 }
  0xfa   : > { %v1954_v2 = vpop.f32.mrf.mxu0 }
  0xfb   : > { %v622_v22 = vadd.f32 %v1954_v2, %v490_v55  ;;  %v694_v32 = vadd.f32 %v661_v25, %v612_v26  ;;  %v1595_v25 = vld [vmem:[%s3193_s11 + $0x60] sm:$0xff]  ;;  %v1610_v26 = vld [vmem:[%s3193_s11 + $0xd8] sm:$0xff] }
  0xfc   : > { %v616_v3 = vpop.f32.mrf.mxu0  ;;  %v481_v9 = vpop.xlane.xlu1 %480 }
  0xfd   : > { %v617_v23 = vadd.f32 %v616_v3, %v487_v57  ;;  %v607_v30 = vadd.f32 %v606_v61, %v481_v9  ;;  %v702_v37 = vmax.f32 %v694_v32, 0.0  ;;  %v1607_v32 = vld [vmem:[%s3193_s11 + $0xc0] sm:$0xff] }
  0xfe   : > { %v1957_v5 = vpop.f32.mrf.mxu0 }
  0xff   : > { %v632_v10 = vadd.f32 %v1957_v5, %v496_v56  ;;  %v695_v29 = vadd.f32 %v666_v13, %v617_v23  ;;  %v693_v36 = vadd.f32 %v656_v34, %v607_v30  ;;  %v1596_v23 = vld [vmem:[%s3193_s11 + $0x68] sm:$0xff]  ;;  %v1606_v34 = vld [vmem:[%s3193_s11 + $0xb8] sm:$0xff] }
 0x100   : > { %v626_v7 = vpop.f32.mrf.mxu0  ;;  %v671_v20 = vpop.permute.xlu1 %670  ;;  %v1608_v30 = vld [vmem:[%s3193_s11 + $0xc8] sm:$0xff] }
 0x101   : > { %v627_v15 = vadd.f32 %v626_v7, %v493_v58  ;;  %v698_v18 = vadd.f32 %v681_v63, %v632_v10  ;;  %v696_v28 = vadd.f32 %v671_v20, %v622_v22  ;;  %v703_v35 = vmax.f32 %v695_v29, 0.0  ;;  %v1613_v20 = vld [vmem:[%s3193_s11 + $0xf0] sm:$0xff]  ;;  %v1612_v22 = vld [vmem:[%s3193_s11 + $0xe8] sm:$0xff] }
 0x102   : > { %v1960_v8 = vpop.f32.mrf.mxu0  ;;  %v701_v38 = vmax.f32 %v693_v36, 0.0  ;;  %v1593_v29 = vld [vmem:[%s3193_s11 + $0x50] sm:$0xff] }
 0x103   : > { %v642_v11 = vadd.f32 %v1960_v8, %v502_v53  ;;  %v697_v24 = vadd.f32 %v676_v6, %v627_v15  ;;  %v706_v27 = vmax.f32 %v698_v18, 0.0  ;;  %v704_v33 = vmax.f32 %v696_v28, 0.0  ;;  %v1614_v18 = vld [vmem:[%s3193_s11 + $0xf8] sm:$0xff]  ;;  %v1609_v28 = vld [vmem:[%s3193_s11 + $0xd0] sm:$0xff] }
 0x104   : > { %v636_v12 = vpop.f32.mrf.mxu0  ;;  %v758_v51 = vpop.permute.xlu1 %757  ;;  %v1605_v36 = vld [vmem:[%s3193_s11 + $0xb0] sm:$0xff] }
 0x105   : > { %v637_v14 = vadd.f32 %v636_v12, %v499_v54  ;;  %v700_v16 = vadd.f32 %v691_v62, %v642_v11  ;;  %v705_v31 = vmax.f32 %v697_v24, 0.0  ;;  %v753_v54 = vpop.permute.xlu0 %752  ;;  %v1611_v24 = vld [vmem:[%s3193_s11 + $0xe0] sm:$0xff] }
 0x107   : > { %v699_v17 = vadd.f32 %v686_v59, %v637_v14  ;;  %v708_v19 = vmax.f32 %v700_v16, 0.0 }
 0x108   : > { %v748_v56 = vpop.permute.xlu1 %747 }
 0x109   : > { %v707_v21 = vmax.f32 %v699_v17, 0.0  ;;  %1961 = vmatprep.subr.mxu1 %v708_v19  ;;  %v743_v63 = vpop.permute.xlu0 %742  ;;  %v903_v17 = vld [vmem:[%s3189_s7] sm:$0x3] }
 0x10a   : > { %1962 = vmatpush3.msra.mxu1 %v708_v19  ;;  %v1598_v19 = vld [vmem:[%s3193_s11 + $0x78] sm:$0xff] }
 0x10b   : > { %1963 = vmatprep.subr.mxu1 %v707_v21 }
 0x10c   : > { %1964 = vmatpush3.msra.mxu1 %v707_v21  ;;  %v738_v4 = vpop.permute.xlu1 %737  ;;  %v1597_v21 = vld [vmem:[%s3193_s11 + $0x70] sm:$0xff] }
 0x10d   : > { %1965 = vmatprep.subr.mxu1 %v706_v27  ;;  %v733_v9 = vpop.permute.xlu0 %732 }
 0x10e   : > { %1966 = vmatpush3.msra.mxu1 %v706_v27  ;;  %v1594_v27 = vld [vmem:[%s3193_s11 + $0x58] sm:$0xff] }
 0x10f   : > { %1967 = vmatprep.subr.mxu1 %v705_v31 }
 0x110   : > { %1968 = vmatpush3.msra.mxu1 %v705_v31  ;;  %v728_v12 = vpop.permute.xlu1 %727  ;;  %v1592_v31 = vld [vmem:[%s3193_s11 + $0x48] sm:$0xff] }
 0x111   : > { %1969 = vmatprep.subr.mxu1 %v704_v33 }
 0x112   : > { %1970 = vmatpush3.msra.mxu1 %v704_v33  ;;  %v1591_v33 = vld [vmem:[%s3193_s11 + $0x40] sm:$0xff] }
 0x113   : > { %1971 = vmatprep.subr.mxu1 %v703_v35 }
 0x114   : > { %1972 = vmatpush3.msra.mxu1 %v703_v35  ;;  %v1590_v35 = vld [vmem:[%s3193_s11 + $0x38] sm:$0xff] }
 0x115   : > { %1973 = vmatprep.subr.mxu1 %v702_v37 }
 0x116   : > { %1974 = vmatpush3.msra.mxu1 %v702_v37  ;;  %v1589_v37 = vld [vmem:[%s3193_s11 + $0x30] sm:$0xff] }
 0x117   : > { %1975 = vmatprep.subr.mxu1 %v701_v38 }
 0x118   : > { %1976 = vmatpush3.msra.mxu1 %v701_v38  ;;  %v1604_v38 = vld [vmem:[%s3193_s11 + $0xa8] sm:$0xff] }
 0x119   : > { %1978 = vmatmul.mubr.msk.f32.vlgmr.msra.gmra.mxu1 %vm765_vm3, %v710_v39  ;;  %v1588_v39 = vld [vmem:[%s3193_s11 + $0x28] sm:$0xff] }
 0x11a   : > { %1980 = vmatprep.mubr.msk.f32.mxu1 %vm765_vm3, %v711_v40  ;;  %v1603_v40 = vld [vmem:[%s3193_s11 + $0xa0] sm:$0xff] }
 0x11d   : > { %1981 = vmatmul.mubr.msk.f32.gmra.mxu1 %vm765_vm3, %v712_v41  ;;  %v1587_v41 = vld [vmem:[%s3193_s11 + $0x20] sm:$0xff] }
 0x11e   : > { %1983 = vmatprep.mubr.msk.f32.mxu1 %vm765_vm3, %v713_v42  ;;  %v1602_v42 = vld [vmem:[%s3193_s11 + $0x98] sm:$0xff] }
 0x121   : > { %1984 = vmatmul.mubr.msk.f32.gmra.mxu1 %vm765_vm3, %v714_v43  ;;  %v1586_v43 = vld [vmem:[%s3193_s11 + $0x18] sm:$0xff] }
 0x122   : > { %1986 = vmatprep.mubr.msk.f32.mxu1 %vm765_vm3, %v715_v44  ;;  %v1601_v44 = vld [vmem:[%s3193_s11 + $0x90] sm:$0xff] }
 0x125   : > { %1987 = vmatmul.mubr.msk.f32.gmra.mxu1 %vm765_vm3, %v716_v45  ;;  %v1585_v45 = vld [vmem:[%s3193_s11 + $0x10] sm:$0xff] }
 0x1d9   : > { %v1979_v47 = vpop.f32.mrf.mxu1 }
 0x1da   : > { %v862_v10 = vadd.f32 %v1979_v47, %v733_v9  ;;  %v988_v47 = vlaneseq }
 0x1db   : > { %v856_v48 = vpop.f32.mrf.mxu1 }
 0x1dc   : > { %v857_v13 = vadd.f32 %v856_v48, %v728_v12  ;;  %v896_v15 = vmax.f32 %v862_v10, 0.0  ;;  %v1584_v48 = vld [vmem:[%s3193_s11 + $0x8] sm:$0xff] }
 0x1dd   : > { %v1982_v50 = vpop.f32.mrf.mxu1 }
 0x1de   : > { %v872_v5 = vadd.f32 %v1982_v50, %v743_v63  ;;  %v895_v16 = vmax.f32 %v857_v13, 0.0  ;;  %v1599_v50 = vld [vmem:[%s3193_s11 + $0x80] sm:$0xff] }
 0x1df   : > { %v866_v52 = vpop.f32.mrf.mxu1 }
 0x1e0   : > { %v867_v7 = vadd.f32 %v866_v52, %v738_v4  ;;  %v898_v11 = vmax.f32 %v872_v5, 0.0 }
 0x1e1   : > { %v1985_v53 = vpop.f32.mrf.mxu1 }
 0x1e2   : > { %v882_v60 = vadd.f32 %v1985_v53, %v753_v54  ;;  %v897_v14 = vmax.f32 %v867_v7, 0.0  ;;  %v1501_v54 = vld [vmem:[%s453_s5] sm:$0x3]  ;;  %s1723_s5 = scalar_lea.hbm %s3194_s12, %s1840_s15 }
 0x1e3   : > { %v876_v55 = vpop.f32.mrf.mxu1 }
 0x1e4   : > { %v877_v2 = vadd.f32 %v876_v55, %v748_v56  ;;  %v900_v6 = vmax.f32 %v882_v60, 0.0  ;;  %v908_v60 = vpop.permute.xlu0 %907 }
 0x1e5   : > { %v1988_v57 = vpop.f32.mrf.mxu1 }
 0x1e6   : > { %v892_v58 = vadd.f32 %v1988_v57, %v763_v49  ;;  %v899_v8 = vmax.f32 %v877_v2, 0.0  ;;  %v2539_v49 = vshrl.u32 %v988_v47, 7  ;;  %v2559_v57 = vld [vmem:[%s449_s26] sm:$0x3]  ;;  %s2173_s26 = smov [#allocation5]  }
 0x1e7   : > { %v886_v59 = vpop.f32.mrf.mxu1  ;;  %s2105_s25 = sshll.u32 %s2173_s26, 4  ;;  %s2106_s25 = int_to_ptr.vmem [resolvable:$false] %s2105_s25 }
 0x1e8   : > { %v902_v61 = vmax.f32 %v892_v58, 0.0  ;;  %v887_v62 = vadd.f32 %v886_v59, %v758_v51  ;;  %v1583_v51 = vld [vmem:[%s3193_s11] sm:$0xff]  ;;  %v1509_v52 = vsub.s32 1, %v2539_v49  ;;  %v2550_v53 = vsub.s32 0, %v2539_v49  ;;  %s2107_s1 = scalar_lea.vmem %s2106_s25, 32  ;;  %p2108_p11 = scmp.lt.s32.totalorder %s3144_s17, %s2106_s25 }
 0x1e9   : > { %v2569_v4 = vadd.s32 120, %v2539_v49  ;;  %v2572_v5 = vadd.s32 240, %v2539_v49  ;;  %v2578_v7 = vadd.s32 232, %v2539_v49  ;;  %v2581_v9 = vadd.s32 104, %v2539_v49  ;;  %p2109_p12 = scmp.lt.s32.totalorder %s2107_s1, %s2101_s20 }
 0x1ea   : > { %v901_v3 = vmax.f32 %v887_v62, 0.0  ;;  %1990 = vmatpush3.msra.mxu0 %v902_v61  ;;  %v1619_v55 = vrot.slane %v1501_v54, %v2550_v53  ;;  %v1623_v56 = vrot.slane %v1501_v54, %v1509_v52  ;;  %v1506_v58 = vrot.slane %v2559_v57, %v2550_v53 }
 0x1eb   : > { %1991 = vmatprep.subr.mxu0 %v2171_v46  ;;  %v1510_v59 = vrot.slane %v2559_v57, %v1509_v52  ;;  %v2587_v10 = vadd.s32 96, %v2539_v49  ;;  %v2593_v12 = vadd.s32 88, %v2539_v49  ;;  %v2596_v13 = vadd.s32 208, %v2539_v49  ;;  %p2110_p13 = por %p2109_p12, %p2108_p11 }
 0x1ec   : > { %1992 = vmatpush3.msra.mxu0 %v901_v3  ;;  %v2566_v3 = vadd.s32 248, %v2539_v49 }
 0x1ed   : > { %1993 = vmatprep.subr.mxu0 %v2171_v46  ;;  %1577 = vmatprep.mubr.f32.mxu1 %v1510_v59  ;;  %p2111_p0 = pnand %p2110_p13, %p2104_p10 }
 0x1ee   : > { %1994 = vmatpush3.msra.mxu0 %v900_v6  ;;  %v2575_v6 = vadd.s32 112, %v2539_v49 }
 0x1ef   : > { %1995 = vmatprep.subr.mxu0 %v2171_v46 }
 0x1f0   : > { %1996 = vmatpush3.msra.mxu0 %v899_v8 }
 0x1f1   : > { %1997 = vmatprep.subr.mxu0 %v2171_v46 }
 0x1f2   : > { %1998 = vmatpush3.msra.mxu0 %v898_v11  ;;  %v2590_v11 = vadd.s32 216, %v2539_v49 }
 0x1f3   : > { %1999 = vmatprep.subr.mxu0 %v2171_v46 }
 0x1f4   : > { %2000 = vmatpush3.msra.mxu0 %v897_v14  ;;  %v2599_v14 = vadd.s32 80, %v2539_v49 }
 0x1f5   : > { %2001 = vmatprep.subr.mxu0 %v2171_v46 }
 0x1f6   : > { %2002 = vmatpush3.msra.mxu0 %v896_v15 }
 0x1f7   : > { %2003 = vmatprep.subr.mxu0 %v2171_v46  ;;  %v1600_v46 = vld [vmem:[%s3193_s11 + $0x88] sm:$0xff] }
 0x1f8   : > { %2004 = vmatpush3.msra.mxu0 %v895_v16  ;;  %v2602_v16 = vadd.s32 200, %v2539_v49 }
 0x1f9   : > { %2006 = vmatmul.mubr.msk.f32.vlgmr.msra.gmra.mxu0 %vm765_vm3, %v903_v17  ;;  %1912 = vmatprep.subr.mxu0 %v1614_v18  ;;  %v2605_v17 = vadd.s32 72, %v2539_v49  ;;  %v2608_v18 = vadd.s32 192, %v2539_v49 }
 0x1fa   : > { %1913 = vmatpush3.msra.mxu0 %v1598_v19  ;;  %1690 = vmatprep.mubr.f32.mxu0 %v1623_v56  ;;  %v2611_v19 = vadd.s32 64, %v2539_v49 }
 0x1fb   : > { %1914 = vmatprep.subr.mxu0 %v1613_v20  ;;  %v2614_v20 = vadd.s32 184, %v2539_v49 }
 0x1fc   : > { %1915 = vmatpush3.msra.mxu0 %v1597_v21  ;;  %v2617_v21 = vadd.s32 56, %v2539_v49 }
 0x1fd   : > { %1916 = vmatprep.subr.mxu0 %v1612_v22  ;;  %v2620_v22 = vadd.s32 176, %v2539_v49 }
 0x1fe   : > { %1917 = vmatpush3.msra.mxu0 %v1596_v23 }
 0x1ff   : > { %1918 = vmatprep.subr.mxu0 %v1611_v24  ;;  %v2623_v24 = vadd.s32 48, %v2539_v49 }
 0x200   : > { %1919 = vmatpush3.msra.mxu0 %v1595_v25  ;;  %v2626_v25 = vadd.s32 168, %v2539_v49 }
 0x201   : > { %1920 = vmatprep.subr.mxu0 %v1610_v26  ;;  %v2629_v26 = vadd.s32 40, %v2539_v49 }
 0x202   : > { %1921 = vmatpush3.msra.mxu0 %v1594_v27  ;;  %v2632_v27 = vadd.s32 160, %v2539_v49 }
 0x203   : > { %1922 = vmatprep.subr.mxu0 %v1609_v28  ;;  %v2635_v28 = vadd.s32 32, %v2539_v49 }
 0x204   : > { %1923 = vmatpush3.msra.mxu0 %v1593_v29  ;;  %v2638_v29 = vadd.s32 152, %v2539_v49 }
 0x205   : > { %1924 = vmatprep.subr.mxu0 %v1608_v30  ;;  %v2641_v30 = vadd.s32 24, %v2539_v49 }
 0x206   : > { %1925 = vmatpush3.msra.mxu0 %v1592_v31 }
 0x207   : > { %1926 = vmatprep.subr.mxu0 %v1607_v32 }
 0x208   : > { %1927 = vmatpush3.msra.mxu0 %v1591_v33 }
 0x209   : > { %1928 = vmatprep.subr.mxu0 %v1606_v34 }
 0x20a   : > { %1929 = vmatpush3.msra.mxu0 %v1590_v35 }
 0x20b   : > { %1930 = vmatprep.subr.mxu0 %v1605_v36  ;;  %v2646_v36 = vadd.s32 144, %v2539_v49 }
 0x20c   : > { %1931 = vmatpush3.msra.mxu0 %v1589_v37 }
 0x20d   : > { %1932 = vmatprep.subr.mxu0 %v1604_v38 }
 0x20e   : > { %1933 = vmatpush3.msra.mxu0 %v1588_v39 }
 0x20f   : > { %1934 = vmatprep.subr.mxu0 %v1603_v40 }
 0x210   : > { %1935 = vmatpush3.msra.mxu0 %v1587_v41 }
 0x211   : > { %1936 = vmatprep.subr.mxu0 %v1602_v42 }
 0x212   : > { %1937 = vmatpush3.msra.mxu0 %v1586_v43 }
 0x213   : > { %1938 = vmatprep.subr.mxu0 %v1601_v44  ;;  %v2711_v44 = vadd.s32 8, %v2539_v49 }
 0x214   : > { %1939 = vmatpush3.msra.mxu0 %v1585_v45 }
 0x215   : > { %1940 = vmatprep.subr.mxu0 %v1600_v46 }
 0x216   : > { %1941 = vmatpush3.msra.mxu0 %v1584_v48 }
 0x217   : > { %1942 = vmatprep.subr.mxu0 %v1599_v50 }
 0x218   : > { %1943 = vmatpush3.msra.mxu0 %v1583_v51 }
 0x219   : > { %1691 = vmatmul.mubr.f32.vlgmr.msra.gmra.mxu0 %v1619_v55 }
 0x2b9   : > { %v979_v61 = vpop.f32.mrf.mxu0 }
 0x2ba   : > { %v980_v62 = vadd.f32 %v979_v61, %v908_v60  ;;  %v2677_v61 = vadd.s32 16, %v2539_v49 }
 0x2bb   : > { %v2007_v63 = vpop.f32.mrf.mxu0 }
 0x2bc   : > { %v983_v2 = vadd.f32 %v980_v62, %v2318_v1  ;;  %v2584_v1 = vadd.s32 224, %v2539_v49 }
 0x2be   : > { %v984_v8 = vadd.f32 1.0, %v983_v2 }
 0x2c0   : > { %v985_v15 = vmul.f32 7.5, %v984_v8 }
 0x2c2   : > { %v986_v23 = vfloor.f32 %v985_v15 }
 0x2c4   : > { %v987_v31 = vsub.f32 %v985_v15, %v986_v23  ;;  %vm1023_vm5 = vcmp.ge.f32.partialorder %v986_v23, 0.0  ;;  %vm1024_vm6 = vcmp.le.f32.partialorder %v986_v23, 15.0  ;;  %v1034_v32 = vmax.f32 %v986_v23, 0.0 }
 0x2c5   : > { %v1026_v33 = vsel %vm1023_vm5, 1, %v2170_v0  ;;  %v1030_v34 = vsel %vm1024_vm6, 1, %v2170_v0  ;;  %v1151_v35 = vadd.f32 1.0, %v986_v23  ;;  %vm2648_vm7 = vmand %vm1023_vm5, %vm1024_vm6 }
 0x2c6   : > { %v1022_v37 = vsub.f32 1.0, %v987_v31  ;;  %v1027_v38 = vrot.slane %v1026_v33, 1  ;;  %v1031_v39 = vrot.slane %v1030_v34, 1  ;;  %v1035_v40 = vmin.f32 %v1034_v32, 15.0 }
 0x2c7   : > { %vm1152_vm8 = vcmp.ge.f32.partialorder %v1151_v35, 0.0  ;;  %vm1157_vm9 = vcmp.le.f32.partialorder %v1151_v35, 15.0  ;;  %v1162_v42 = vmax.f32 %v1151_v35, 0.0  ;;  %v1170_v43 = vrot.slane %v987_v31, 1 }
 0x2c8   : > { %vm2652_vm10 = vcmp.ne.s32.totalorder %v1027_v38, 0  ;;  %vm2656_vm11 = vcmp.ne.s32.totalorder %v1031_v39, 0  ;;  %v1036_v46 = vmul.f32 16.0, %v1035_v40  ;;  %v1038_v47 = vrot.slane %v1035_v40, 1  ;;  %vm2660_vm12 = vmand %vm1152_vm8, %vm1157_vm9 }
 0x2c9   : > { %vm1029_vm13 = vmand %vm2648_vm7, %vm2652_vm10  ;;  %v1043_v50 = vrot.slane %v1022_v37, 1  ;;  %v1153_v51 = vsel %vm1152_vm8, 1, %v2170_v0  ;;  %v1158_v52 = vsel %vm1157_vm9, 1, %v2170_v0  ;;  %v1163_v54 = vmin.f32 %v1162_v42, 15.0 }
 0x2ca   : > { %vm2672_vm14 = vmand %vm1029_vm13, %vm2656_vm11  ;;  %v1040_v56 = vadd.f32 %v1038_v47, %v1036_v46  ;;  %v1154_v59 = vrot.slane %v1153_v51, 1  ;;  %v1159_v60 = vrot.slane %v1158_v52, 1  ;;  %v1172_v32 = vmul.f32 %v1170_v43, %v1022_v37 }
 0x2cb   : > { %v1045_v62 = vmul.f32 %v1043_v50, %v1022_v37  ;;  %v1165_v63 = vrot.slane %v1163_v54, 1  ;;  %vm1279_vm15 = vmand %vm2660_vm12, %vm2652_vm10  ;;  %v1281_v0 = vmul.f32 16.0, %v1163_v54  ;;  %v1284_v2 = vmul.f32 %v1043_v50, %v987_v31 }
 0x2cc   : > { %v2008_v8 = vtrunc.f32 %v1040_v56  ;;  %vm2683_vm0 = vcmp.ne.s32.totalorder %v1154_v59, 0  ;;  %vm2687_vm1 = vcmp.ne.s32.totalorder %v1159_v60, 0  ;;  %vm2693_vm2 = vmand %vm1279_vm15, %vm2656_vm11  ;;  %v2708_v42 = vadd.s32 136, %v2539_v49 }
 0x2cd   : > { %v1046_v34 = vsel %vm2672_vm14, %v1045_v62, 0.0  ;;  %vm1156_vm3 = vmand %vm2648_vm7, %vm2683_vm0  ;;  %v1167_v35 = vadd.f32 %v1165_v63, %v1036_v46  ;;  %v1282_v38 = vadd.f32 %v1281_v0, %v1038_v47  ;;  %v1285_v39 = vsel %vm2693_vm2, %v1284_v2, 0.0 }
 0x2ce   : > { %v2009_v37 = vcvt.f32.s32 %v2008_v8  ;;  %vm1161_vm4 = vmand %vm1156_vm3, %vm2687_vm1  ;;  %v1392_v40 = vadd.f32 %v1281_v0, %v1165_v63  ;;  %v1394_v46 = vmul.f32 %v1170_v43, %v987_v31  ;;  %v2721_v51 = vrot.slane %v1046_v34, %v2550_v53 }
 0x2cf   : > { %v2010_v45 = vtrunc.f32 %v1167_v35  ;;  %v1173_v50 = vsel %vm1161_vm4, %v1172_v32, 0.0  ;;  %v2012_v41 = vtrunc.f32 %v1282_v38  ;;  %vm1390_vm5 = vmand %vm2660_vm12, %vm2683_vm0  ;;  %v2724_v52 = vrot.slane %v1285_v39, %v2550_v53 }
 0x2d0   : > { %v2718_v47 = vrot.slane %v2009_v37, %v2550_v53  ;;  %vm1391_vm6 = vmand %vm1390_vm5, %vm2687_vm1  ;;  %v2014_v54 = vtrunc.f32 %v1392_v40  ;;  %v2729_v56 = vrot.slane %v1173_v50, %v2550_v53 }
 0x2d1   : > { %v2011_v55 = vcvt.f32.s32 %v2010_v45  ;;  %v2013_v48 = vcvt.f32.s32 %v2012_v41  ;;  %v1395_v59 = vsel %vm1391_vm6, %v1394_v46, 0.0 }
 0x2d2   : > { %v2015_v31 = vcvt.f32.s32 %v2014_v54  ;;  %v2732_v43 = vrot.slane %v1395_v59, %v2550_v53  ;;  %vm1082_vm7 = vcmp.eq.s32.totalorder %v2566_v3, %v2718_v47  ;;  %vm1066_vm8 = vcmp.eq.s32.totalorder %v2569_v4, %v2718_v47 }
 0x2d3   : > { %v2739_v60 = vrot.slane %v2011_v55, %v2550_v53  ;;  %v2742_v62 = vrot.slane %v2013_v48, %v2550_v53  ;;  %v1118_v63 = vsel %vm1082_vm7, %v2721_v51, 0.0  ;;  %v1102_v0 = vsel %vm1066_vm8, %v2721_v51, 0.0 }
 0x2d4   : > { %v2747_v2 = vrot.slane %v2015_v31, %v2550_v53  ;;  %vm1081_vm9 = vcmp.eq.s32.totalorder %v2572_v5, %v2718_v47  ;;  %vm1065_vm10 = vcmp.eq.s32.totalorder %v2575_v6, %v2718_v47  ;;  %vm1080_vm11 = vcmp.eq.s32.totalorder %v2578_v7, %v2718_v47 }
 0x2d5   : > { %vm1209_vm12 = vcmp.eq.s32.totalorder %v2566_v3, %v2739_v60  ;;  %vm1321_vm13 = vcmp.eq.s32.totalorder %v2566_v3, %v2742_v62  ;;  %vm1193_vm14 = vcmp.eq.s32.totalorder %v2569_v4, %v2739_v60  ;;  %vm1305_vm15 = vcmp.eq.s32.totalorder %v2569_v4, %v2742_v62 }
 0x2d6   : > { %v1245_v8 = vsel %vm1209_vm12, %v2729_v56, 0.0  ;;  %v1357_v15 = vsel %vm1321_vm13, %v2724_v52, 0.0  ;;  %vm1431_vm0 = vcmp.eq.s32.totalorder %v2566_v3, %v2747_v2  ;;  %v1229_v23 = vsel %vm1193_vm14, %v2729_v56, 0.0 }
 0x2d7   : > { %v1277_v32 = vadd.f32 %v1245_v8, %v1118_v63  ;;  %v1467_v33 = vsel %vm1431_vm0, %v2732_v43, 0.0  ;;  %v1261_v34 = vadd.f32 %v1229_v23, %v1102_v0  ;;  %v1341_v35 = vsel %vm1305_vm15, %v2724_v52, 0.0 }
 0x2d8   : > { %vm1415_vm1 = vcmp.eq.s32.totalorder %v2569_v4, %v2747_v2  ;;  %v1117_v38 = vsel %vm1081_vm9, %v2721_v51, 0.0  ;;  %vm1208_vm2 = vcmp.eq.s32.totalorder %v2572_v5, %v2739_v60  ;;  %vm1320_vm3 = vcmp.eq.s32.totalorder %v2572_v5, %v2742_v62 }
 0x2d9   : > { %v1389_v3 = vadd.f32 %v1357_v15, %v1277_v32  ;;  %v1373_v39 = vadd.f32 %v1341_v35, %v1261_v34  ;;  %v1451_v37 = vsel %vm1415_vm1, %v2732_v43, 0.0  ;;  %v1244_v40 = vsel %vm1208_vm2, %v2729_v56, 0.0 }
 0x2da   : > { %v1276_v45 = vadd.f32 %v1244_v40, %v1117_v38  ;;  %v1356_v4 = vsel %vm1320_vm3, %v2724_v52, 0.0  ;;  %vm1430_vm4 = vcmp.eq.s32.totalorder %v2572_v5, %v2747_v2  ;;  %v1101_v50 = vsel %vm1065_vm10, %v2721_v51, 0.0 }
 0x2db   : > { %v1499_v41 = vadd.f32 %v1467_v33, %v1389_v3  ;;  %v1483_v46 = vadd.f32 %v1451_v37, %v1373_v39  ;;  %v1466_v54 = vsel %vm1430_vm4, %v2732_v43, 0.0  ;;  %vm1192_vm5 = vcmp.eq.s32.totalorder %v2575_v6, %v2739_v60 }
 0x2dc   : > { %v1388_v55 = vadd.f32 %v1356_v4, %v1276_v45  ;;  %v1228_v48 = vsel %vm1192_vm5, %v2729_v56, 0.0  ;;  %vm1304_vm6 = vcmp.eq.s32.totalorder %v2575_v6, %v2742_v62  ;;  %vm1414_vm7 = vcmp.eq.s32.totalorder %v2575_v6, %v2747_v2 }
 0x2dd   : > { %1877 = vmatprep.subr.mxu1 %v1499_v41  ;;  %v1260_v5 = vadd.f32 %v1228_v48, %v1101_v50  ;;  %v1340_v59 = vsel %vm1304_vm6, %v2724_v52, 0.0  ;;  %v1450_v31 = vsel %vm1414_vm7, %v2732_v43, 0.0  ;;  %v1116_v63 = vsel %vm1080_vm11, %v2721_v51, 0.0 }
 0x2de   : > { %1878 = vmatpush3.msra.mxu1 %v1483_v46  ;;  %v1498_v0 = vadd.f32 %v1466_v54, %v1388_v55  ;;  %vm1207_vm8 = vcmp.eq.s32.totalorder %v2578_v7, %v2739_v60  ;;  %vm1319_vm9 = vcmp.eq.s32.totalorder %v2578_v7, %v2742_v62  ;;  %vm1429_vm10 = vcmp.eq.s32.totalorder %v2578_v7, %v2747_v2 }
 0x2df   : > { %v1372_v6 = vadd.f32 %v1340_v59, %v1260_v5  ;;  %v1243_v8 = vsel %vm1207_vm8, %v2729_v56, 0.0  ;;  %v1355_v15 = vsel %vm1319_vm9, %v2724_v52, 0.0  ;;  %v1465_v23 = vsel %vm1429_vm10, %v2732_v43, 0.0 }
 0x2e0   : > { %1879 = vmatprep.subr.mxu1 %v1498_v0  ;;  %v1275_v32 = vadd.f32 %v1243_v8, %v1116_v63  ;;  %vm1064_vm11 = vcmp.eq.s32.totalorder %v2581_v9, %v2718_v47  ;;  %vm1191_vm12 = vcmp.eq.s32.totalorder %v2581_v9, %v2739_v60  ;;  %vm1303_vm13 = vcmp.eq.s32.totalorder %v2581_v9, %v2742_v62 }
 0x2e1   : > { %v1482_v33 = vadd.f32 %v1450_v31, %v1372_v6  ;;  %v1100_v7 = vsel %vm1064_vm11, %v2721_v51, 0.0  ;;  %v1227_v34 = vsel %vm1191_vm12, %v2729_v56, 0.0  ;;  %v1339_v35 = vsel %vm1303_vm13, %v2724_v52, 0.0 }
 0x2e2   : > { %v1387_v38 = vadd.f32 %v1355_v15, %v1275_v32  ;;  %v1259_v3 = vadd.f32 %v1227_v34, %v1100_v7  ;;  %vm1413_vm14 = vcmp.eq.s32.totalorder %v2581_v9, %v2747_v2  ;;  %vm1079_vm15 = vcmp.eq.s32.totalorder %v2584_v1, %v2718_v47 }
 0x2e3   : > { %1880 = vmatpush3.msra.mxu1 %v1482_v33  ;;  %v1449_v39 = vsel %vm1413_vm14, %v2732_v43, 0.0  ;;  %v1115_v37 = vsel %vm1079_vm15, %v2721_v51, 0.0  ;;  %vm1206_vm0 = vcmp.eq.s32.totalorder %v2584_v1, %v2739_v60  ;;  %vm1318_vm1 = vcmp.eq.s32.totalorder %v2584_v1, %v2742_v62 }
 0x2e4   : > { %v1497_v40 = vadd.f32 %v1465_v23, %v1387_v38  ;;  %v1371_v45 = vadd.f32 %v1339_v35, %v1259_v3  ;;  %v1242_v4 = vsel %vm1206_vm0, %v2729_v56, 0.0  ;;  %v1354_v9 = vsel %vm1318_vm1, %v2724_v52, 0.0 }
 0x2e5   : > { %v1274_v50 = vadd.f32 %v1242_v4, %v1115_v37  ;;  %vm1428_vm2 = vcmp.eq.s32.totalorder %v2584_v1, %v2747_v2  ;;  %vm1063_vm3 = vcmp.eq.s32.totalorder %v2587_v10, %v2718_v47  ;;  %vm1190_vm4 = vcmp.eq.s32.totalorder %v2587_v10, %v2739_v60 }
 0x2e6   : > { %1881 = vmatprep.subr.mxu1 %v1497_v40  ;;  %v1481_v41 = vadd.f32 %v1449_v39, %v1371_v45  ;;  %v1464_v46 = vsel %vm1428_vm2, %v2732_v43, 0.0  ;;  %v1099_v54 = vsel %vm1063_vm3, %v2721_v51, 0.0  ;;  %v1226_v55 = vsel %vm1190_vm4, %v2729_v56, 0.0 }
 0x2e7   : > { %v1386_v48 = vadd.f32 %v1354_v9, %v1274_v50  ;;  %v1258_v5 = vadd.f32 %v1226_v55, %v1099_v54  ;;  %vm1302_vm5 = vcmp.eq.s32.totalorder %v2587_v10, %v2742_v62  ;;  %vm1412_vm6 = vcmp.eq.s32.totalorder %v2587_v10, %v2747_v2 }
 0x2e8   : > { %1882 = vmatpush3.msra.mxu1 %v1481_v41  ;;  %v1338_v1 = vsel %vm1302_vm5, %v2724_v52, 0.0  ;;  %v1448_v59 = vsel %vm1412_vm6, %v2732_v43, 0.0  ;;  %vm1078_vm7 = vcmp.eq.s32.totalorder %v2590_v11, %v2718_v47  ;;  %vm1205_vm8 = vcmp.eq.s32.totalorder %v2590_v11, %v2739_v60 }
 0x2e9   : > { %v1496_v31 = vadd.f32 %v1464_v46, %v1386_v48  ;;  %v1370_v63 = vadd.f32 %v1338_v1, %v1258_v5  ;;  %v1114_v0 = vsel %vm1078_vm7, %v2721_v51, 0.0  ;;  %v1241_v6 = vsel %vm1205_vm8, %v2729_v56, 0.0 }
 0x2ea   : > { %v1273_v8 = vadd.f32 %v1241_v6, %v1114_v0  ;;  %vm1317_vm9 = vcmp.eq.s32.totalorder %v2590_v11, %v2742_v62  ;;  %vm1427_vm10 = vcmp.eq.s32.totalorder %v2590_v11, %v2747_v2  ;;  %vm1062_vm11 = vcmp.eq.s32.totalorder %v2593_v12, %v2718_v47 }
 0x2eb   : > { %1883 = vmatprep.subr.mxu1 %v1496_v31  ;;  %v1480_v10 = vadd.f32 %v1448_v59, %v1370_v63  ;;  %v1353_v15 = vsel %vm1317_vm9, %v2724_v52, 0.0  ;;  %v1463_v23 = vsel %vm1427_vm10, %v2732_v43, 0.0  ;;  %v2863_v32 = vadd.s32 128, %v2539_v49 }
 0x2ec   : > { %v1385_v33 = vadd.f32 %v1353_v15, %v1273_v8  ;;  %v1098_v7 = vsel %vm1062_vm11, %v2721_v51, 0.0  ;;  %vm1189_vm12 = vcmp.eq.s32.totalorder %v2593_v12, %v2739_v60  ;;  %vm1301_vm13 = vcmp.eq.s32.totalorder %v2593_v12, %v2742_v62 }
 0x2ed   : > { %1884 = vmatpush3.msra.mxu1 %v1480_v10  ;;  %v1225_v11 = vsel %vm1189_vm12, %v2729_v56, 0.0  ;;  %v1337_v34 = vsel %vm1301_vm13, %v2724_v52, 0.0  ;;  %vm1411_vm14 = vcmp.eq.s32.totalorder %v2593_v12, %v2747_v2  ;;  %vm1077_vm15 = vcmp.eq.s32.totalorder %v2596_v13, %v2718_v47 }
 0x2ee   : > { %v1495_v35 = vadd.f32 %v1463_v23, %v1385_v33  ;;  %v1257_v38 = vadd.f32 %v1225_v11, %v1098_v7  ;;  %v1113_v3 = vsel %vm1077_vm15, %v2721_v51, 0.0  ;;  %vm1204_vm0 = vcmp.eq.s32.totalorder %v2596_v13, %v2739_v60 }
 0x2ef   : > { %v1240_v39 = vsel %vm1204_vm0, %v2729_v56, 0.0  ;;  %vm1316_vm1 = vcmp.eq.s32.totalorder %v2596_v13, %v2742_v62  ;;  %vm1426_vm2 = vcmp.eq.s32.totalorder %v2596_v13, %v2747_v2  ;;  %vm1061_vm3 = vcmp.eq.s32.totalorder %v2599_v14, %v2718_v47 }
 0x2f0   : > { %1885 = vmatprep.subr.mxu1 %v1495_v35  ;;  %v1369_v12 = vadd.f32 %v1337_v34, %v1257_v38  ;;  %v1447_v37 = vsel %vm1411_vm14, %v2732_v43, 0.0  ;;  %v1272_v40 = vadd.f32 %v1240_v39, %v1113_v3  ;;  %v1352_v45 = vsel %vm1316_vm1, %v2724_v52, 0.0 }
 0x2f1   : > { %v1462_v4 = vsel %vm1426_vm2, %v2732_v43, 0.0  ;;  %v1097_v9 = vsel %vm1061_vm3, %v2721_v51, 0.0  ;;  %vm1188_vm4 = vcmp.eq.s32.totalorder %v2599_v14, %v2739_v60  ;;  %vm1300_vm5 = vcmp.eq.s32.totalorder %v2599_v14, %v2742_v62 }
 0x2f2   : > { %v1479_v13 = vadd.f32 %v1447_v37, %v1369_v12  ;;  %v1384_v50 = vadd.f32 %v1352_v45, %v1272_v40  ;;  %v1224_v41 = vsel %vm1188_vm4, %v2729_v56, 0.0  ;;  %vm1410_vm6 = vcmp.eq.s32.totalorder %v2599_v14, %v2747_v2 }
 0x2f3   : > { %v1256_v46 = vadd.f32 %v1224_v41, %v1097_v9  ;;  %v1336_v54 = vsel %vm1300_vm5, %v2724_v52, 0.0  ;;  %vm1076_vm7 = vcmp.eq.s32.totalorder %v2602_v16, %v2718_v47  ;;  %vm1203_vm8 = vcmp.eq.s32.totalorder %v2602_v16, %v2739_v60 }
 0x2f4   : > { %1886 = vmatpush3.msra.mxu1 %v1479_v13  ;;  %v1494_v55 = vadd.f32 %v1462_v4, %v1384_v50  ;;  %v1112_v48 = vsel %vm1076_vm7, %v2721_v51, 0.0  ;;  %v1239_v5 = vsel %vm1203_vm8, %v2729_v56, 0.0  ;;  %vm1315_vm9 = vcmp.eq.s32.totalorder %v2602_v16, %v2742_v62 }
 0x2f5   : > { %v1368_v1 = vadd.f32 %v1336_v54, %v1256_v46  ;;  %v1446_v14 = vsel %vm1410_vm6, %v2732_v43, 0.0  ;;  %v1271_v59 = vadd.f32 %v1239_v5, %v1112_v48  ;;  %vm1425_vm10 = vcmp.eq.s32.totalorder %v2602_v16, %v2747_v2 }
 0x2f6   : > { %1887 = vmatprep.subr.mxu1 %v1494_v55  ;;  %v1351_v31 = vsel %vm1315_vm9, %v2724_v52, 0.0  ;;  %vm1060_vm11 = vcmp.eq.s32.totalorder %v2605_v17, %v2718_v47  ;;  %vm1187_vm12 = vcmp.eq.s32.totalorder %v2605_v17, %v2739_v60  ;;  %vm1299_vm13 = vcmp.eq.s32.totalorder %v2605_v17, %v2742_v62 }
 0x2f7   : > { %v1478_v63 = vadd.f32 %v1446_v14, %v1368_v1  ;;  %v1383_v0 = vadd.f32 %v1351_v31, %v1271_v59  ;;  %v1096_v6 = vsel %vm1060_vm11, %v2721_v51, 0.0  ;;  %v1223_v8 = vsel %vm1187_vm12, %v2729_v56, 0.0 }
 0x2f8   : > { %v1461_v16 = vsel %vm1425_vm10, %v2732_v43, 0.0  ;;  %v1255_v10 = vadd.f32 %v1223_v8, %v1096_v6  ;;  %vm1409_vm14 = vcmp.eq.s32.totalorder %v2605_v17, %v2747_v2  ;;  %vm1075_vm15 = vcmp.eq.s32.totalorder %v2608_v18, %v2718_v47 }
 0x2f9   : > { %1888 = vmatpush3.msra.mxu1 %v1478_v63  ;;  %v1493_v15 = vadd.f32 %v1461_v16, %v1383_v0  ;;  %v1335_v23 = vsel %vm1299_vm13, %v2724_v52, 0.0  ;;  %v1111_v33 = vsel %vm1075_vm15, %v2721_v51, 0.0  ;;  %vm1202_vm0 = vcmp.eq.s32.totalorder %v2608_v18, %v2739_v60 }
 0x2fa   : > { %v1367_v7 = vadd.f32 %v1335_v23, %v1255_v10  ;;  %v1238_v11 = vsel %vm1202_vm0, %v2729_v56, 0.0  ;;  %vm1314_vm1 = vcmp.eq.s32.totalorder %v2608_v18, %v2742_v62  ;;  %vm1424_vm2 = vcmp.eq.s32.totalorder %v2608_v18, %v2747_v2 }
 0x2fb   : > { %1889 = vmatprep.subr.mxu1 %v1493_v15  ;;  %v1445_v17 = vsel %vm1409_vm14, %v2732_v43, 0.0  ;;  %v1270_v34 = vadd.f32 %v1238_v11, %v1111_v33  ;;  %v1350_v35 = vsel %vm1314_vm1, %v2724_v52, 0.0  ;;  %vm1059_vm3 = vcmp.eq.s32.totalorder %v2611_v19, %v2718_v47 }
 0x2fc   : > { %v1477_v38 = vadd.f32 %v1445_v17, %v1367_v7  ;;  %v1460_v3 = vsel %vm1424_vm2, %v2732_v43, 0.0  ;;  %vm1186_vm4 = vcmp.eq.s32.totalorder %v2611_v19, %v2739_v60  ;;  %vm1298_vm5 = vcmp.eq.s32.totalorder %v2611_v19, %v2742_v62 }
 0x2fd   : > { %v1382_v39 = vadd.f32 %v1350_v35, %v1270_v34  ;;  %v1095_v18 = vsel %vm1059_vm3, %v2721_v51, 0.0  ;;  %v1222_v12 = vsel %vm1186_vm4, %v2729_v56, 0.0  ;;  %vm1408_vm6 = vcmp.eq.s32.totalorder %v2611_v19, %v2747_v2 }
 0x2fe   : > { %1890 = vmatpush3.msra.mxu1 %v1477_v38  ;;  %v1254_v37 = vadd.f32 %v1222_v12, %v1095_v18  ;;  %v1334_v40 = vsel %vm1298_vm5, %v2724_v52, 0.0  ;;  %vm1074_vm7 = vcmp.eq.s32.totalorder %v2614_v20, %v2718_v47  ;;  %vm1201_vm8 = vcmp.eq.s32.totalorder %v2614_v20, %v2739_v60 }
 0x2ff   : > { %v1492_v45 = vadd.f32 %v1460_v3, %v1382_v39  ;;  %v1110_v4 = vsel %vm1074_vm7, %v2721_v51, 0.0  ;;  %v1237_v9 = vsel %vm1201_vm8, %v2729_v56, 0.0  ;;  %vm1313_vm9 = vcmp.eq.s32.totalorder %v2614_v20, %v2742_v62 }
 0x300   : > { %v1366_v13 = vadd.f32 %v1334_v40, %v1254_v37  ;;  %v1444_v19 = vsel %vm1408_vm6, %v2732_v43, 0.0  ;;  %v1269_v50 = vadd.f32 %v1237_v9, %v1110_v4  ;;  %vm1423_vm10 = vcmp.eq.s32.totalorder %v2614_v20, %v2747_v2 }
 0x301   : > { %1891 = vmatprep.subr.mxu1 %v1492_v45  ;;  %v1349_v41 = vsel %vm1313_vm9, %v2724_v52, 0.0  ;;  %vm1058_vm11 = vcmp.eq.s32.totalorder %v2617_v21, %v2718_v47  ;;  %vm1185_vm12 = vcmp.eq.s32.totalorder %v2617_v21, %v2739_v60  ;;  %vm1297_vm13 = vcmp.eq.s32.totalorder %v2617_v21, %v2742_v62 }
 0x302   : > { %v1476_v46 = vadd.f32 %v1444_v19, %v1366_v13  ;;  %v1381_v54 = vadd.f32 %v1349_v41, %v1269_v50  ;;  %v1094_v55 = vsel %vm1058_vm11, %v2721_v51, 0.0  ;;  %v1221_v48 = vsel %vm1185_vm12, %v2729_v56, 0.0 }
 0x303   : > { %v1459_v20 = vsel %vm1423_vm10, %v2732_v43, 0.0  ;;  %v1253_v5 = vadd.f32 %v1221_v48, %v1094_v55  ;;  %vm1407_vm14 = vcmp.eq.s32.totalorder %v2617_v21, %v2747_v2  ;;  %vm1073_vm15 = vcmp.eq.s32.totalorder %v2620_v22, %v2718_v47 }
 0x304   : > { %1892 = vmatpush3.msra.mxu1 %v1476_v46  ;;  %v1491_v1 = vadd.f32 %v1459_v20, %v1381_v54  ;;  %v1333_v14 = vsel %vm1297_vm13, %v2724_v52, 0.0  ;;  %v1109_v59 = vsel %vm1073_vm15, %v2721_v51, 0.0  ;;  %vm1200_vm0 = vcmp.eq.s32.totalorder %v2620_v22, %v2739_v60 }
 0x305   : > { %v1365_v31 = vadd.f32 %v1333_v14, %v1253_v5  ;;  %v1236_v63 = vsel %vm1200_vm0, %v2729_v56, 0.0  ;;  %vm1312_vm1 = vcmp.eq.s32.totalorder %v2620_v22, %v2742_v62  ;;  %vm1422_vm2 = vcmp.eq.s32.totalorder %v2620_v22, %v2747_v2 }
 0x306   : > { %1893 = vmatprep.subr.mxu1 %v1491_v1  ;;  %v1443_v21 = vsel %vm1407_vm14, %v2732_v43, 0.0  ;;  %v1268_v0 = vadd.f32 %v1236_v63, %v1109_v59  ;;  %v1348_v6 = vsel %vm1312_vm1, %v2724_v52, 0.0  ;;  %vm1057_vm3 = vcmp.eq.s32.totalorder %v2623_v24, %v2718_v47 }
 0x307   : > { %v1475_v8 = vadd.f32 %v1443_v21, %v1365_v31  ;;  %v1458_v16 = vsel %vm1422_vm2, %v2732_v43, 0.0  ;;  %vm1184_vm4 = vcmp.eq.s32.totalorder %v2623_v24, %v2739_v60  ;;  %vm1296_vm5 = vcmp.eq.s32.totalorder %v2623_v24, %v2742_v62 }
 0x308   : > { %v1380_v10 = vadd.f32 %v1348_v6, %v1268_v0  ;;  %v1093_v22 = vsel %vm1057_vm3, %v2721_v51, 0.0  ;;  %v1220_v15 = vsel %vm1184_vm4, %v2729_v56, 0.0  ;;  %vm1406_vm6 = vcmp.eq.s32.totalorder %v2623_v24, %v2747_v2 }
 0x309   : > { %1894 = vmatpush3.msra.mxu1 %v1475_v8  ;;  %v1252_v23 = vadd.f32 %v1220_v15, %v1093_v22  ;;  %v1332_v33 = vsel %vm1296_vm5, %v2724_v52, 0.0  ;;  %vm1072_vm7 = vcmp.eq.s32.totalorder %v2626_v25, %v2718_v47  ;;  %vm1199_vm8 = vcmp.eq.s32.totalorder %v2626_v25, %v2739_v60 }
 0x30a   : > { %v1490_v7 = vadd.f32 %v1458_v16, %v1380_v10  ;;  %v1108_v11 = vsel %vm1072_vm7, %v2721_v51, 0.0  ;;  %v1235_v17 = vsel %vm1199_vm8, %v2729_v56, 0.0  ;;  %vm1311_vm9 = vcmp.eq.s32.totalorder %v2626_v25, %v2742_v62 }
 0x30b   : > { %v1364_v34 = vadd.f32 %v1332_v33, %v1252_v23  ;;  %v1442_v24 = vsel %vm1406_vm6, %v2732_v43, 0.0  ;;  %v1267_v35 = vadd.f32 %v1235_v17, %v1108_v11  ;;  %vm1421_vm10 = vcmp.eq.s32.totalorder %v2626_v25, %v2747_v2 }
 0x30c   : > { %1895 = vmatprep.subr.mxu1 %v1490_v7  ;;  %v1347_v38 = vsel %vm1311_vm9, %v2724_v52, 0.0  ;;  %vm1056_vm11 = vcmp.eq.s32.totalorder %v2629_v26, %v2718_v47  ;;  %vm1183_vm12 = vcmp.eq.s32.totalorder %v2629_v26, %v2739_v60  ;;  %vm1295_vm13 = vcmp.eq.s32.totalorder %v2629_v26, %v2742_v62 }
 0x30d   : > { %v1474_v3 = vadd.f32 %v1442_v24, %v1364_v34  ;;  %v1379_v39 = vadd.f32 %v1347_v38, %v1267_v35  ;;  %v1092_v18 = vsel %vm1056_vm11, %v2721_v51, 0.0  ;;  %v1219_v12 = vsel %vm1183_vm12, %v2729_v56, 0.0 }
 0x30e   : > { %v1457_v25 = vsel %vm1421_vm10, %v2732_v43, 0.0  ;;  %v1251_v37 = vadd.f32 %v1219_v12, %v1092_v18  ;;  %vm1405_vm14 = vcmp.eq.s32.totalorder %v2629_v26, %v2747_v2  ;;  %vm1071_vm15 = vcmp.eq.s32.totalorder %v2632_v27, %v2718_v47 }
 0x30f   : > { %1896 = vmatpush3.msra.mxu1 %v1474_v3  ;;  %v1489_v40 = vadd.f32 %v1457_v25, %v1379_v39  ;;  %v1331_v45 = vsel %vm1295_vm13, %v2724_v52, 0.0  ;;  %v1107_v4 = vsel %vm1071_vm15, %v2721_v51, 0.0  ;;  %vm1198_vm0 = vcmp.eq.s32.totalorder %v2632_v27, %v2739_v60 }
 0x310   : > { %v1363_v9 = vadd.f32 %v1331_v45, %v1251_v37  ;;  %v1234_v13 = vsel %vm1198_vm0, %v2729_v56, 0.0  ;;  %vm1310_vm1 = vcmp.eq.s32.totalorder %v2632_v27, %v2742_v62  ;;  %vm1420_vm2 = vcmp.eq.s32.totalorder %v2632_v27, %v2747_v2 }
 0x311   : > { %1897 = vmatprep.subr.mxu1 %v1489_v40  ;;  %v1441_v26 = vsel %vm1405_vm14, %v2732_v43, 0.0  ;;  %v1266_v19 = vadd.f32 %v1234_v13, %v1107_v4  ;;  %v1346_v50 = vsel %vm1310_vm1, %v2724_v52, 0.0  ;;  %vm1055_vm3 = vcmp.eq.s32.totalorder %v2635_v28, %v2718_v47 }
 0x312   : > { %v1473_v41 = vadd.f32 %v1441_v26, %v1363_v9  ;;  %v1456_v46 = vsel %vm1420_vm2, %v2732_v43, 0.0  ;;  %vm1182_vm4 = vcmp.eq.s32.totalorder %v2635_v28, %v2739_v60  ;;  %vm1294_vm5 = vcmp.eq.s32.totalorder %v2635_v28, %v2742_v62 }
 0x313   : > { %v1378_v54 = vadd.f32 %v1346_v50, %v1266_v19  ;;  %v1091_v27 = vsel %vm1055_vm3, %v2721_v51, 0.0  ;;  %v1218_v55 = vsel %vm1182_vm4, %v2729_v56, 0.0  ;;  %vm1404_vm6 = vcmp.eq.s32.totalorder %v2635_v28, %v2747_v2 }
 0x314   : > { %1898 = vmatpush3.msra.mxu1 %v1473_v41  ;;  %v1250_v48 = vadd.f32 %v1218_v55, %v1091_v27  ;;  %v1330_v20 = vsel %vm1294_vm5, %v2724_v52, 0.0  ;;  %vm1070_vm7 = vcmp.eq.s32.totalorder %v2638_v29, %v2718_v47  ;;  %vm1197_vm8 = vcmp.eq.s32.totalorder %v2638_v29, %v2739_v60 }
 0x315   : > { %v1488_v5 = vadd.f32 %v1456_v46, %v1378_v54  ;;  %v1106_v1 = vsel %vm1070_vm7, %v2721_v51, 0.0  ;;  %v1233_v14 = vsel %vm1197_vm8, %v2729_v56, 0.0  ;;  %vm1309_vm9 = vcmp.eq.s32.totalorder %v2638_v29, %v2742_v62 }
 0x316   : > { %v1362_v59 = vadd.f32 %v1330_v20, %v1250_v48  ;;  %v1440_v28 = vsel %vm1404_vm6, %v2732_v43, 0.0  ;;  %v1265_v31 = vadd.f32 %v1233_v14, %v1106_v1  ;;  %vm1419_vm10 = vcmp.eq.s32.totalorder %v2638_v29, %v2747_v2 }
 0x317   : > { %1899 = vmatprep.subr.mxu1 %v1488_v5  ;;  %v1345_v63 = vsel %vm1309_vm9, %v2724_v52, 0.0  ;;  %vm1054_vm11 = vcmp.eq.s32.totalorder %v2641_v30, %v2718_v47  ;;  %vm1181_vm12 = vcmp.eq.s32.totalorder %v2641_v30, %v2739_v60  ;;  %vm1293_vm13 = vcmp.eq.s32.totalorder %v2641_v30, %v2742_v62 }
 0x318   : > { %v1472_v21 = vadd.f32 %v1440_v28, %v1362_v59  ;;  %v1377_v0 = vadd.f32 %v1345_v63, %v1265_v31  ;;  %v1090_v6 = vsel %vm1054_vm11, %v2721_v51, 0.0  ;;  %v1217_v8 = vsel %vm1181_vm12, %v2729_v56, 0.0 }
 0x319   : > { %v1455_v29 = vsel %vm1419_vm10, %v2732_v43, 0.0  ;;  %v1249_v16 = vadd.f32 %v1217_v8, %v1090_v6  ;;  %vm1403_vm14 = vcmp.eq.s32.totalorder %v2641_v30, %v2747_v2  ;;  %vm1069_vm15 = vcmp.eq.s32.totalorder %v2646_v36, %v2718_v47 }
 0x31a   : > { %1900 = vmatpush3.msra.mxu1 %v1472_v21  ;;  %v1487_v10 = vadd.f32 %v1455_v29, %v1377_v0  ;;  %v1329_v22 = vsel %vm1293_vm13, %v2724_v52, 0.0  ;;  %v1105_v15 = vsel %vm1069_vm15, %v2721_v51, 0.0  ;;  %vm1196_vm0 = vcmp.eq.s32.totalorder %v2646_v36, %v2739_v60 }
 0x31b   : > { %v1361_v23 = vadd.f32 %v1329_v22, %v1249_v16  ;;  %v1232_v33 = vsel %vm1196_vm0, %v2729_v56, 0.0  ;;  %vm1308_vm1 = vcmp.eq.s32.totalorder %v2646_v36, %v2742_v62  ;;  %vm1418_vm2 = vcmp.eq.s32.totalorder %v2646_v36, %v2747_v2 }
 0x31c   : > { %1901 = vmatprep.subr.mxu1 %v1487_v10  ;;  %v1439_v30 = vsel %vm1403_vm14, %v2732_v43, 0.0  ;;  %v1264_v7 = vadd.f32 %v1232_v33, %v1105_v15  ;;  %v1344_v11 = vsel %vm1308_vm1, %v2724_v52, 0.0  ;;  %vm1053_vm3 = vcmp.eq.s32.totalorder %v2677_v61, %v2718_v47 }
 0x31d   : > { %v1471_v17 = vadd.f32 %v1439_v30, %v1361_v23  ;;  %v1454_v34 = vsel %vm1418_vm2, %v2732_v43, 0.0  ;;  %vm1180_vm4 = vcmp.eq.s32.totalorder %v2677_v61, %v2739_v60  ;;  %vm1292_vm5 = vcmp.eq.s32.totalorder %v2677_v61, %v2742_v62 }
 0x31e   : > { %v1376_v24 = vadd.f32 %v1344_v11, %v1264_v7  ;;  %v1089_v36 = vsel %vm1053_vm3, %v2721_v51, 0.0  ;;  %v1216_v35 = vsel %vm1180_vm4, %v2729_v56, 0.0  ;;  %vm1402_vm6 = vcmp.eq.s32.totalorder %v2677_v61, %v2747_v2 }
 0x31f   : > { %1902 = vmatpush3.msra.mxu1 %v1471_v17  ;;  %v1248_v38 = vadd.f32 %v1216_v35, %v1089_v36  ;;  %v1328_v3 = vsel %vm1292_vm5, %v2724_v52, 0.0  ;;  %vm1068_vm7 = vcmp.eq.s32.totalorder %v2708_v42, %v2718_v47  ;;  %vm1195_vm8 = vcmp.eq.s32.totalorder %v2708_v42, %v2739_v60 }
 0x320   : > { %v1486_v39 = vadd.f32 %v1454_v34, %v1376_v24  ;;  %v1104_v18 = vsel %vm1068_vm7, %v2721_v51, 0.0  ;;  %v1231_v12 = vsel %vm1195_vm8, %v2729_v56, 0.0  ;;  %vm1307_vm9 = vcmp.eq.s32.totalorder %v2708_v42, %v2742_v62 }
 0x321   : > { %v1360_v25 = vadd.f32 %v1328_v3, %v1248_v38  ;;  %v1438_v61 = vsel %vm1402_vm6, %v2732_v43, 0.0  ;;  %v1263_v37 = vadd.f32 %v1231_v12, %v1104_v18  ;;  %vm1417_vm10 = vcmp.eq.s32.totalorder %v2708_v42, %v2747_v2 }
 0x322   : > { %1903 = vmatprep.subr.mxu1 %v1486_v39  ;;  %v1343_v40 = vsel %vm1307_vm9, %v2724_v52, 0.0  ;;  %vm1052_vm11 = vcmp.eq.s32.totalorder %v2711_v44, %v2718_v47  ;;  %vm1179_vm12 = vcmp.eq.s32.totalorder %v2711_v44, %v2739_v60  ;;  %vm1291_vm13 = vcmp.eq.s32.totalorder %v2711_v44, %v2742_v62 }
 0x323   : > { %v1470_v45 = vadd.f32 %v1438_v61, %v1360_v25  ;;  %v1375_v4 = vadd.f32 %v1343_v40, %v1263_v37  ;;  %v1088_v9 = vsel %vm1052_vm11, %v2721_v51, 0.0  ;;  %v1215_v13 = vsel %vm1179_vm12, %v2729_v56, 0.0 }
 0x324   : > { %v1453_v42 = vsel %vm1417_vm10, %v2732_v43, 0.0  ;;  %v1247_v26 = vadd.f32 %v1215_v13, %v1088_v9  ;;  %vm1401_vm14 = vcmp.eq.s32.totalorder %v2711_v44, %v2747_v2  ;;  %vm1067_vm15 = vcmp.eq.s32.totalorder %v2863_v32, %v2718_v47 }
 0x325   : > { %1904 = vmatpush3.msra.mxu1 %v1470_v45  ;;  %v1485_v19 = vadd.f32 %v1453_v42, %v1375_v4  ;;  %v1327_v50 = vsel %vm1291_vm13, %v2724_v52, 0.0  ;;  %vm1194_vm0 = vcmp.eq.s32.totalorder %v2863_v32, %v2739_v60  ;;  %v1103_v46 = vsel %vm1067_vm15, %v2721_v51, 0.0 }
 0x326   : > { %v1359_v41 = vadd.f32 %v1327_v50, %v1247_v26  ;;  %v1230_v54 = vsel %vm1194_vm0, %v2729_v56, 0.0  ;;  %vm1306_vm1 = vcmp.eq.s32.totalorder %v2863_v32, %v2742_v62  ;;  %v1437_v44 = vsel %vm1401_vm14, %v2732_v43, 0.0 }
 0x327   : > { %1905 = vmatprep.subr.mxu1 %v1485_v19  ;;  %v1262_v27 = vadd.f32 %v1230_v54, %v1103_v46  ;;  %vm1416_vm2 = vcmp.eq.s32.totalorder %v2863_v32, %v2747_v2  ;;  %vm1051_vm3 = vcmp.eq.s32.totalorder %v2539_v49, %v2718_v47  ;;  %v1342_v48 = vsel %vm1306_vm1, %v2724_v52, 0.0 }
 0x328   : > { %v1469_v55 = vadd.f32 %v1437_v44, %v1359_v41  ;;  %vm1178_vm4 = vcmp.eq.s32.totalorder %v2539_v49, %v2739_v60  ;;  %vm1290_vm5 = vcmp.eq.s32.totalorder %v2539_v49, %v2742_v62  ;;  %v1087_v5 = vsel %vm1051_vm3, %v2721_v51, 0.0  ;;  %v1944_v51 = vpop.f32.mrf.mxu0 }
 0x329   : > { %v1374_v20 = vadd.f32 %v1342_v48, %v1262_v27  ;;  %v1214_v1 = vsel %vm1178_vm4, %v2729_v56, 0.0  ;;  %v1452_v32 = vsel %vm1416_vm2, %v2732_v43, 0.0  ;;  %vm1400_vm6 = vcmp.eq.s32.totalorder %v2539_v49, %v2747_v2 }
 0x32a   : > { %1906 = vmatpush3.msra.mxu1 %v1469_v55  ;;  %v1246_v14 = vadd.f32 %v1214_v1, %v1087_v5  ;;  %v1326_v59 = vsel %vm1290_vm5, %v2724_v52, 0.0  ;;  %v1436_v60 = vsel %vm1400_vm6, %v2732_v43, 0.0  ;;  %v1945_v31 = vpop.f32.mrf.mxu0  ;;  %vm1698_vm7 = vcmask 1040384  }
 0x32b   : > { %v1484_v47 = vadd.f32 %v1452_v32, %v1374_v20  ;;  %v1946_v21 = vadd.f32 %v1945_v31, %v1944_v51 }
 0x32c   : > { %v1358_v28 = vadd.f32 %v1326_v59, %v1246_v14 }
 0x32d   : > { %1907 = vmatprep.subr.mxu1 %v1484_v47 }
 0x32e   : > { %v1468_v62 = vadd.f32 %v1436_v60, %v1358_v28 }
 0x330   : > { %1908 = vmatpush3.msra.mxu1 %v1468_v62 }
 0x331   : > { %1578 = vmatmul.mubr.f32.vlgmr.msra.gmra.mxu1 %v1506_v58 }
 0x3f1   : > { %v1909_v56 = vpop.f32.mrf.mxu1 }
 0x3f3   : > { %v1910_v63 = vpop.f32.mrf.mxu1 }
 0x3f4   : > { %v1911_v49 = vadd.f32 %v1910_v63, %v1909_v56 }
 0x3f6   : > { %v1696_v2 = vsub.f32 %v1911_v49, %v1946_v21 }
 0x3f8   : > { %v1697_v52 = vmul.f32 %v1696_v2, %v1696_v2 }
 0x3fa   : > { %v1699_v0 = vsel %vm1698_vm7, %v1697_v52, 0.0 }
 0x3fb   : > { %1700 = vadd.xlane.f32.xlu1 %v1699_v0 }
 0x484   : > { %v1701_v43 = vpop.xlane.xlu1 %1700 }
 0x485   : > { %v1702_v6 = vrot.slane %v1701_v43, 4 }
 0x487   : > { %v1703_v8 = vadd.f32 %v1702_v6, %v1701_v43 }
 0x489   : > { %v1704_v29 = vrot.slane %v1703_v8, 2 }
 0x48b   : > { %v1705_v16 = vadd.f32 %v1704_v29, %v1703_v8 }
 0x48d   : > { %v1706_v53 = vrot.slane %v1705_v16, 1 }
 0x48f   : > { %v1707_v57 = vadd.f32 %v1706_v53, %v1705_v16 }
 0x491   : > { %2016 = vpush %v1707_v57 }
 0x4c2   : > { %s2017_s16 = spop %2016 }
 0x4c3   : > { %v1709_v58 = vstv %s2017_s16 }
 0x4c4   : > { %1711 = vst [vmem:[%s442_s28] sm:$0x1] %v1709_v58 }
 0x4c5   : > { %2114 = shalt.err (!%p2111_p0)
}
 0x4c6   : > { %s2115_s2 = scalar_lea.hbm %s1723_s5, 16  ;;  %s2119_s15 = scalar_lea.hbm %s3194_s12, 32 }
 0x4c7   : > { %p2116_p1 = scmp.ne.s32.totalorder %s1723_s5, %s2115_s2  ;;  %p2120_p4 = scmp.lt.s32.totalorder %s1723_s5, %s3194_s12 }
 0x4c8   : > { %p2121_p7 = scmp.lt.s32.totalorder %s2119_s15, %s2115_s2 }
 0x4c9   : > { %p2117_p2 = pnand %p2116_p1, %p2277_p5 }
 0x4ca   : > { %p2122_p8 = por %p2121_p7, %p2120_p4 }
 0x4cb   : > { %p2118_p3 = pneg %p2117_p2 }
 0x4cd   : > { %p2123_p6 = pnand %p2122_p8, %p2118_p3 }
 0x4cf   : > { %2126 = shalt.err (!%p2123_p6)
}
 0x4d0   : > { %2022 = dma.vmem_to_hbm [thread:$0]  (%p2277_p5), %s3144_s17, 16, %s1723_s5, %s1713_s0  }
 0x4d1 PF: > { %p2034_p9 = scmp.ge.s32.totalorder %s2165_s24, 2  ;;  %s1737_s1 = sand.u32 1, %s2153_s21  }
 0x4d2   : > { %p3222_p10 = scmp.ne.s32.totalorder %s3200_s14, 0  ;;  %s1738_s19 = scalar_lea.sflag [#allocation4], %s1737_s1 }
 0x4d4   : > { %p2029_p11 = pnand %p2034_p9, %p3222_p10 }
 0x4d6   : > { %p2030_p12 = pneg %p2029_p11 }
 0x4d8   : > { %2148 = dma.done.wait (%p2030_p12), %s1738_s19, 16  }
 0x4d9   : > { %2150 = vsyncadd (%p2030_p12), %s1738_s19, 4294967280  ;;  %p23_p13 = scmp.ge.s32.totalorder %s2264_s27, 4   ;;  %s3223_s21 = smov %s2157_s22 }
 0x4da   : > { %s3224_s22 = smov %s2161_s23  ;;  %s3225_s23 = smov %s2275_s30 }
 0x4db   : > { %s3226_s24 = smov %s2264_s27  ;;  %25 = sbr.rel (!%p23_p13) target bundleno = 9 (0x9), region = 114 }
 0x4e0   :  { %1742 = vsyncpa [#allocation3], 1 }
 0x4e1   :  { %1744 = vsyncpa [#allocation3 + $0x1], 1 }
 0x4e2   :  { %1745 = vsyncpa [#allocation4], 1 }
 0x4e3   :  { %1747 = vsyncpa [#allocation4 + $0x1], 1 }

</bundles_post_ra>
